<compile_context>
chip_gen: v7x
topology: tpu7x:2x2x1
jax: 0.10.0
libtpu: 0.0.40
codegen_flags: <defaults>
</compile_context>

<pallas_src>
import math

import jax
import jax.numpy as jnp
from jax import lax
from jax.experimental import pallas as pl
from jax.experimental.pallas import tpu as pltpu

_NEG = -1e30  # finite "-inf"; plain Python float so it is never captured as a jax const


def _round_up(x, m):
    return (x + m - 1) // m * m


def _make_clip_kernel(*, with_ids, has_pad, resident_tgt, block_m, block_n,
                      batch, precision):
    """Build the kernel body; every flag/size here is static Python."""

    def kernel(*refs):
        if with_ids:
            (s_ref, src_ref, tgt_ref, rid_ref, cid_ref,
             row_out, col_out, src_s, rmax, rse, rdot, rcnt) = refs
        else:
            (s_ref, src_ref, tgt_ref,
             row_out, col_out, src_s, rmax, rse, rdot) = refs

        i = pl.program_id(0)          # row-block (outer, "parallel")
        j = pl.program_id(1)          # col-block (inner, "arbitrary")
        nj = pl.num_programs(1)

        # -- per-row-block init: fold exp(scale) into src once; reset row state
        @pl.when(j == 0)
        def _():
            src_s[...] = (src_ref[...].astype(jnp.float32)
                          * s_ref[0]).astype(src_s.dtype)
            rmax[...] = jnp.full_like(rmax, _NEG)
            rse[...] = jnp.zeros_like(rse)
            rdot[...] = jnp.zeros_like(rdot)
            if with_ids:
                rcnt[...] = jnp.zeros_like(rcnt)

        # -- (block_m, block_n) logits tile on the MXU --------------------------
        if resident_tgt:
            col0 = pl.multiple_of(j * block_n, block_n)
            rhs = tgt_ref[:, pl.ds(col0, block_n)]
        else:
            rhs = tgt_ref[...]
        logits = lax.dot_general(
            src_s[...], rhs,
            dimension_numbers=(((1,), (0,)), ((), ())),
            preferred_element_type=jnp.float32,
            precision=precision)                         # (block_m, block_n) f32

        # -- padded rows / cols (compiled out when batch is a block multiple) ---
        if has_pad:
            row_idx = i * block_m + lax.broadcasted_iota(jnp.int32, (block_m, 1), 0)
            col_idx = j * block_n + lax.broadcasted_iota(jnp.int32, (1, block_n), 1)
            vrow = row_idx < batch
            vcol = col_idx < batch
            l_row = jnp.where(vcol, logits, _NEG)
            l_col = jnp.where(vrow, logits, _NEG)
        else:
            l_row = logits
            l_col = logits

        # -- row-direction online LSE --------------------------------------------
        old_m = rmax[...]
        new_m = jnp.maximum(old_m, jnp.max(l_row, axis=-1, keepdims=True))
        rse[...] = (rse[...] * jnp.exp(old_m - new_m)
                    + jnp.sum(jnp.exp(l_row - new_m), axis=-1, keepdims=True))
        rmax[...] = new_m

        # -- per-tile column LSE (merged across row blocks outside the kernel) ---
        cmax = jnp.max(l_col, axis=0, keepdims=True)               # (1, block_n)
        csum = jnp.sum(jnp.exp(l_col - cmax), axis=0, keepdims=True)
        col_out[...] = (cmax + jnp.log(csum)).reshape(1, 1, block_n)

        # -- positive-pair sums ----------------------------------------------------
        if with_ids:
            m = rid_ref[...] == cid_ref[...]                       # (block_m, block_n)
            if has_pad:
                m = jnp.logical_and(m, vcol)
            mf = m.astype(jnp.float32)
            rdot[...] += jnp.sum(mf * logits, axis=-1, keepdims=True)
            rcnt[...] += jnp.sum(mf, axis=-1, keepdims=True)
        else:
            # Identity targets: positives exist only on diagonal tiles.
            on_diag = jnp.logical_and(j * block_n < (i + 1) * block_m,
                                      i * block_m < (j + 1) * block_n)

            @pl.when(on_diag)
            def _():
                if has_pad:
                    ri, ci = row_idx, col_idx
                else:
                    ri = i * block_m + lax.broadcasted_iota(jnp.int32, (block_m, 1), 0)
                    ci = j * block_n + lax.broadcasted_iota(jnp.int32, (1, block_n), 1)
                dm = (ri == ci).astype(jnp.float32)
                rdot[...] += jnp.sum(dm * logits, axis=-1, keepdims=True)

        # -- per-row term at the end of the row sweep -----------------------------
        @pl.when(j == nj - 1)
        def _():
            lse_row = rmax[...] + jnp.log(rse[...])
            if with_ids:
                row_out[...] = lse_row - 2.0 * rdot[...] / jnp.maximum(rcnt[...], 1.0)
            else:
                row_out[...] = lse_row - 2.0 * rdot[...]   # n_r == 1 for identity ids

    return kernel


def clip_loss(scale_log, source_embeddings, target_embeddings, sample_ids=None, *,
              block_m=None, block_n=None, resident_tgt=None,
              resident_vmem_budget=12 * 1024 * 1024,   # v7x-safe (64 MiB VMEM);
                                                       # raise on v5e/v6e (128 MiB)
              precision=None):
    """Pallas implementation of CLIPLoss.forward (single device)."""
    B, D = source_embeddings.shape
    assert target_embeddings.shape == (B, D)

    # block_n: MXU-native lane width (use 128 on v5e, 256 on v6e/v7x).
    if block_n is None:
        block_n = 256 if B >= 256 else 128
    block_n = max(128, _round_up(block_n, 128))
    # block_m: tall row blocks cut target HBM re-streaming (scales 1/block_m)
    # and grid-step overhead; keep it a multiple of block_n so b_pad tiles both.
    if block_m is None:
        block_m = 512
    block_m = _round_up(max(block_m, block_n), block_n)
    block_m = min(block_m, _round_up(B, block_n))
    b_pad = _round_up(B, block_m)
    pad = b_pad - B
    has_pad = pad > 0
    ni, nj = b_pad // block_m, b_pad // block_n

    src = source_embeddings
    tgt = target_embeddings
    if has_pad:
        src = jnp.pad(src, ((0, pad), (0, 0)))
        tgt = jnp.pad(tgt, ((0, pad), (0, 0)))
    tgt_t = tgt.T                                      # (D, b_pad): (K, N), lane-dense

    # VMEM-resident target (DMA'd once) when it fits a conservative budget.
    if resident_tgt is None:
        resident_tgt = tgt_t.dtype.itemsize * D * b_pad <= resident_vmem_budget

    s_arr = jnp.exp(jnp.asarray(scale_log, jnp.float32)).reshape(1)

    with_ids = sample_ids is not None
    smem = pltpu.MemorySpace.SMEM
    in_specs = [
        pl.BlockSpec(memory_space=smem),                          # exp(scale)
        pl.BlockSpec((block_m, D), lambda i, j: (i, 0)),          # source row block
        (pl.BlockSpec((D, b_pad), lambda i, j: (0, 0)) if resident_tgt
         else pl.BlockSpec((D, block_n), lambda i, j: (0, j))),   # target (resident/stream)
    ]
    inputs = [s_arr, src, tgt_t]
    if with_ids:
        ids = jnp.asarray(sample_ids).astype(jnp.int32)
        if has_pad:
            ids = jnp.pad(ids, (0, pad), constant_values=-1)      # masked out anyway
        inputs += [ids.reshape(b_pad, 1), ids.reshape(1, b_pad)]
        in_specs += [pl.BlockSpec((block_m, 1), lambda i, j: (i, 0)),
                     pl.BlockSpec((1, block_n), lambda i, j: (0, j))]

    scratch = [pltpu.VMEM((block_m, D), src.dtype),     # exp(scale)-scaled src block
               pltpu.VMEM((block_m, 1), jnp.float32),   # row running max
               pltpu.VMEM((block_m, 1), jnp.float32),   # row running sum-exp
               pltpu.VMEM((block_m, 1), jnp.float32)]   # row positive-dot
    if with_ids:
        scratch.append(pltpu.VMEM((block_m, 1), jnp.float32))  # row positive-count

    kernel = _make_clip_kernel(with_ids=with_ids, has_pad=has_pad,
                               resident_tgt=resident_tgt,
                               block_m=block_m, block_n=block_n,
                               batch=B, precision=precision)

    row_terms, col_lse_parts = pl.pallas_call(
        kernel,
        out_shape=(jax.ShapeDtypeStruct((b_pad, 1), jnp.float32),
                   jax.ShapeDtypeStruct((ni, 1, b_pad), jnp.float32)),
        grid=(ni, nj),
        in_specs=in_specs,
        out_specs=(pl.BlockSpec((block_m, 1), lambda i, j: (i, 0)),
                   pl.BlockSpec((1, 1, block_n), lambda i, j: (i, 0, j))),
        scratch_shapes=scratch,
        compiler_params=pltpu.CompilerParams(
            # No cross-row-block carries -> the outer axis may be split across
            # TensorCores (v7x); the inner axis carries the row online-LSE.
            dimension_semantics=("parallel", "arbitrary"),
            # TODO(synk): re-derive for v7x (64 MiB physical) if tiles or the
            # resident-target budget are raised.
            vmem_limit_bytes=48 * 1024 * 1024,
        ),
    )(*inputs)

    # Tiny O(B) epilogue in plain XLA: merge the per-row-block column LSEs,
    # drop padded rows/columns, and reduce (pairwise sums, no long f32 carry).
    lse_col = jax.nn.logsumexp(col_lse_parts[:, 0, :B], axis=0)    # (B,)
    return 0.5 * (jnp.sum(row_terms[:B, 0]) + jnp.sum(lse_col)) / B


def clip_loss_reference(scale_log, src, tgt, sample_ids=None, precision=None):
    """Plain-JAX reference mirroring the PyTorch module."""
    B = src.shape[0]
    if sample_ids is None:
        sample_ids = jnp.arange(B)
    logits = jnp.exp(scale_log) * jnp.matmul(src, tgt.T, precision=precision)
    id_mask = sample_ids[:, None] == sample_ids[None, :]
    probs = jax.nn.softmax(jnp.where(id_mask, 1.0, -jnp.inf), axis=-1)
    ce_fwd = -jnp.mean(jnp.sum(probs * jax.nn.log_softmax(logits, axis=-1), axis=-1))
    ce_bwd = -jnp.mean(jnp.sum(probs * jax.nn.log_softmax(logits.T, axis=-1), axis=-1))
    return 0.5 * (ce_fwd + ce_bwd)


if __name__ == "__main__":
    key = jax.random.PRNGKey(0)
    k1, k2, k3, k4, k5 = jax.random.split(key, 5)
    scale_log = math.log(1.0 / 0.07)      # module's parameter init
    hp = lax.Precision.HIGHEST            # exact f32 check; production would feed bf16

    def unit(x):
        return x / jnp.linalg.norm(x, axis=-1, keepdims=True)

    # 1) B=200 pads to 256: 2x2 grid of 128x128 tiles, identity (arange) targets,
    #    VMEM-resident target path, padding masks active.
    B, D = 200, 64
    src = unit(jax.random.normal(k1, (B, D), jnp.float32))
    tgt = unit(jax.random.normal(k2, (B, D), jnp.float32))
    loss = clip_loss(scale_log, src, tgt, block_m=128, block_n=128, precision=hp)
    jax.block_until_ready(loss)
    ref = clip_loss_reference(scale_log, src, tgt, precision=hp)
    assert jnp.allclose(loss, ref, atol=2e-3, rtol=2e-3), (loss, ref)

    # 2) repeated sample ids (multi-positive soft targets), rectangular 256x128
    #    tiles, streamed-target path.
    ids = jax.random.randint(k3, (B,), 0, B // 2, dtype=jnp.int32)
    loss_ids = clip_loss(scale_log, src, tgt, sample_ids=ids,
                         block_m=256, block_n=128, resident_tgt=False,
                         precision=hp)
    jax.block_until_ready(loss_ids)
    ref_ids = clip_loss_reference(scale_log, src, tgt, ids, precision=hp)
    assert jnp.allclose(loss_ids, ref_ids, atol=2e-3, rtol=2e-3), (loss_ids, ref_ids)

    # 3) exact block multiple (no padding): the mask-free kernel specialization.
    B2 = 256
    src2 = unit(jax.random.normal(k4, (B2, D), jnp.float32))
    tgt2 = unit(jax.random.normal(k5, (B2, D), jnp.float32))
    loss2 = clip_loss(scale_log, src2, tgt2, block_m=128, block_n=128, precision=hp)
    jax.block_until_ready(loss2)
    ref2 = clip_loss_reference(scale_log, src2, tgt2, precision=hp)
    assert jnp.allclose(loss2, ref2, atol=2e-3, rtol=2e-3), (loss2, ref2)

    print("KERNEL_OK")
</pallas_src>

<mosaic_0001>
module attributes {stable_mosaic.version = 11 : i64} {
  func.func @kernel(%arg0: i32, %arg1: i32, %arg2: memref<1xf32, #tpu.memory_space<smem>>, %arg3: memref<128x64xf32, #tpu.memory_space<vmem>>, %arg4: memref<64x256xf32, #tpu.memory_space<vmem>>, %arg5: memref<128x1xf32, #tpu.memory_space<vmem>>, %arg6: memref<1x1x128xf32, #tpu.memory_space<vmem>>, %arg7: memref<128x64xf32, #tpu.memory_space<vmem>>, %arg8: memref<128x1xf32, #tpu.memory_space<vmem>>, %arg9: memref<128x1xf32, #tpu.memory_space<vmem>>, %arg10: memref<128x1xf32, #tpu.memory_space<vmem>>) attributes {dimension_semantics = [#tpu.dimension_semantics<parallel>, #tpu.dimension_semantics<arbitrary>], iteration_bounds = array<i64: 2, 2>, scalar_prefetch = 0 : i64, scratch_operands = 4 : i64, tpu.core_type = #tpu.core_type<tc>, window_params = [{transform_indices = @transform_0, window_bounds = array<i64: 1>}, {transform_indices = @transform_1, window_bounds = array<i64: 128, 64>}, {pipeline_mode = #tpu.pipeline_mode<synchronous>, transform_indices = @transform_2, window_bounds = array<i64: 64, 256>}, {transform_indices = @transform_3, window_bounds = array<i64: 128, 1>}, {transform_indices = @transform_4, window_bounds = array<i64: 1, 1, 128>}]} {
    %c0_i32 = arith.constant 0 : i32
    %0 = arith.cmpi eq, %arg1, %c0_i32 : i32
    %1 = arith.extui %0 : i1 to i32
    %c0_i32_0 = arith.constant 0 : i32
    %2 = arith.cmpi ne, %1, %c0_i32_0 : i32
    scf.if %2 {
      %c0_31 = arith.constant 0 : index
      %c0_32 = arith.constant 0 : index
      %70 = vector.load %arg3[%c0_31, %c0_32] : memref<128x64xf32, #tpu.memory_space<vmem>>, vector<128x64xf32>
      %c0_33 = arith.constant 0 : index
      %71 = memref.load %arg2[%c0_33] : memref<1xf32, #tpu.memory_space<smem>>
      %72 = vector.broadcast %71 : f32 to vector<128x64xf32>
      %73 = arith.mulf %70, %72 : vector<128x64xf32>
      %c0_34 = arith.constant 0 : index
      %c0_35 = arith.constant 0 : index
      %74 = vector.load %arg7[%c0_34, %c0_35] : memref<128x64xf32, #tpu.memory_space<vmem>>, vector<128x64xf32>
      tpu.vector_store %arg7[%c0_34, %c0_35], %73 {strides = array<i32>} : memref<128x64xf32, #tpu.memory_space<vmem>>, vector<128x64xf32>,
      %cst_36 = arith.constant -1.000000e+30 : f32
      %75 = vector.broadcast %cst_36 : f32 to vector<128x1xf32>
      %c0_37 = arith.constant 0 : index
      %c0_38 = arith.constant 0 : index
      %76 = vector.load %arg8[%c0_37, %c0_38] : memref<128x1xf32, #tpu.memory_space<vmem>>, vector<128x1xf32>
      tpu.vector_store %arg8[%c0_37, %c0_38], %75 {strides = array<i32>} : memref<128x1xf32, #tpu.memory_space<vmem>>, vector<128x1xf32>,
      %cst_39 = arith.constant 0.000000e+00 : f32
      %77 = vector.broadcast %cst_39 : f32 to vector<128x1xf32>
      %c0_40 = arith.constant 0 : index
      %c0_41 = arith.constant 0 : index
      %78 = vector.load %arg9[%c0_40, %c0_41] : memref<128x1xf32, #tpu.memory_space<vmem>>, vector<128x1xf32>
      tpu.vector_store %arg9[%c0_40, %c0_41], %77 {strides = array<i32>} : memref<128x1xf32, #tpu.memory_space<vmem>>, vector<128x1xf32>,
      %cst_42 = arith.constant 0.000000e+00 : f32
      %79 = vector.broadcast %cst_42 : f32 to vector<128x1xf32>
      %c0_43 = arith.constant 0 : index
      %c0_44 = arith.constant 0 : index
      %80 = vector.load %arg10[%c0_43, %c0_44] : memref<128x1xf32, #tpu.memory_space<vmem>>, vector<128x1xf32>
      tpu.vector_store %arg10[%c0_43, %c0_44], %79 {strides = array<i32>} : memref<128x1xf32, #tpu.memory_space<vmem>>, vector<128x1xf32>,
    } else {
    }
    %c128_i32 = arith.constant 128 : i32
    %3 = arith.muli %arg1, %c128_i32 : i32
    %4 = tpu.assume_multiple %3, 128 : i32
    %c0 = arith.constant 0 : index
    %5 = arith.index_cast %4 : i32 to index
    %6 = vector.load %arg4[%c0, %5] : memref<64x256xf32, #tpu.memory_space<vmem>>, vector<64x128xf32>
    %c0_1 = arith.constant 0 : index
    %c0_2 = arith.constant 0 : index
    %7 = vector.load %arg7[%c0_1, %c0_2] : memref<128x64xf32, #tpu.memory_space<vmem>>, vector<128x64xf32>
    %cst = arith.constant dense<0.000000e+00> : vector<128x128xf32>
    %8 = tpu.matmul %7, %6, %cst {dimension_numbers = #tpu.dot_dimension_numbers<[1], [0], [0], [1], [0, 0, 1, 1], [], []>, precision = #tpu.contract_precision<fp32>} : vector<128x64xf32>, vector<64x128xf32>, vector<128x128xf32> -> vector<128x128xf32>
    %c128_i32_3 = arith.constant 128 : i32
    %9 = arith.muli %arg0, %c128_i32_3 : i32
    %10 = tpu.iota {dimensions = array<i32: 0>} : vector<128x1xi32>
    %11 = vector.broadcast %9 : i32 to vector<128x1xi32>
    %12 = arith.addi %11, %10 : vector<128x1xi32>
    %c128_i32_4 = arith.constant 128 : i32
    %13 = arith.muli %arg1, %c128_i32_4 : i32
    %14 = tpu.iota {dimensions = array<i32: 1>} : vector<1x128xi32>
    %15 = vector.broadcast %13 : i32 to vector<1x128xi32>
    %16 = arith.addi %15, %14 : vector<1x128xi32>
    %c200_i32 = arith.constant 200 : i32
    %17 = vector.broadcast %c200_i32 : i32 to vector<128x1xi32>
    %18 = arith.cmpi slt, %12, %17 : vector<128x1xi32>
    %c200_i32_5 = arith.constant 200 : i32
    %19 = vector.broadcast %c200_i32_5 : i32 to vector<1x128xi32>
    %20 = arith.cmpi slt, %16, %19 : vector<1x128xi32>
    %cst_6 = arith.constant -1.000000e+30 : f32
    %21 = vector.shape_cast %20 : vector<1x128xi1> to vector<1x128xi1>
    %22 = vector.broadcast %21 : vector<1x128xi1> to vector<128x128xi1>
    %23 = vector.broadcast %cst_6 : f32 to vector<128x128xf32>
    %24 = arith.select %22, %8, %23 : vector<128x128xi1>, vector<128x128xf32>
    %cst_7 = arith.constant -1.000000e+30 : f32
    %25 = vector.shape_cast %18 : vector<128x1xi1> to vector<128x1xi1>
    %26 = vector.broadcast %25 : vector<128x1xi1> to vector<128x128xi1>
    %27 = vector.broadcast %cst_7 : f32 to vector<128x128xf32>
    %28 = arith.select %26, %8, %27 : vector<128x128xi1>, vector<128x128xf32>
    %c0_8 = arith.constant 0 : index
    %c0_9 = arith.constant 0 : index
    %29 = vector.load %arg8[%c0_8, %c0_9] : memref<128x1xf32, #tpu.memory_space<vmem>>, vector<128x1xf32>
    %cst_10 = arith.constant dense<0xFF800000> : vector<128xf32>
    %30 = vector.multi_reduction <maximumf>, %24, %cst_10 [1] : vector<128x128xf32> to vector<128xf32>
    %31 = vector.shape_cast %30 : vector<128xf32> to vector<128x1xf32>
    %32 = arith.maximumf %29, %31 : vector<128x1xf32>
    %c0_11 = arith.constant 0 : index
    %c0_12 = arith.constant 0 : index
    %33 = vector.load %arg9[%c0_11, %c0_12] : memref<128x1xf32, #tpu.memory_space<vmem>>, vector<128x1xf32>
    %34 = arith.subf %29, %32 : vector<128x1xf32>
    %35 = math.exp %34 : vector<128x1xf32>
    %36 = arith.mulf %33, %35 : vector<128x1xf32>
    %37 = vector.broadcast %32 : vector<128x1xf32> to vector<128x128xf32>
    %38 = arith.subf %24, %37 : vector<128x128xf32>
    %39 = math.exp %38 : vector<128x128xf32>
    %cst_13 = arith.constant dense<0.000000e+00> : vector<128xf32>
    %40 = vector.multi_reduction <add>, %39, %cst_13 [1] : vector<128x128xf32> to vector<128xf32>
    %41 = vector.shape_cast %40 : vector<128xf32> to vector<128x1xf32>
    %42 = arith.addf %36, %41 : vector<128x1xf32>
    %c0_14 = arith.constant 0 : index
    %c0_15 = arith.constant 0 : index
    %43 = vector.load %arg9[%c0_14, %c0_15] : memref<128x1xf32, #tpu.memory_space<vmem>>, vector<128x1xf32>
    tpu.vector_store %arg9[%c0_14, %c0_15], %42 {strides = array<i32>} : memref<128x1xf32, #tpu.memory_space<vmem>>, vector<128x1xf32>,
    %c0_16 = arith.constant 0 : index
    %c0_17 = arith.constant 0 : index
    %44 = vector.load %arg8[%c0_16, %c0_17] : memref<128x1xf32, #tpu.memory_space<vmem>>, vector<128x1xf32>
    tpu.vector_store %arg8[%c0_16, %c0_17], %32 {strides = array<i32>} : memref<128x1xf32, #tpu.memory_space<vmem>>, vector<128x1xf32>,
    %cst_18 = arith.constant dense<0xFF800000> : vector<128xf32>
    %45 = vector.multi_reduction <maximumf>, %28, %cst_18 [0] : vector<128x128xf32> to vector<128xf32>
    %46 = vector.shape_cast %45 : vector<128xf32> to vector<1x128xf32>
    %47 = vector.broadcast %46 : vector<1x128xf32> to vector<128x128xf32>
    %48 = arith.subf %28, %47 : vector<128x128xf32>
    %49 = math.exp %48 : vector<128x128xf32>
    %cst_19 = arith.constant dense<0.000000e+00> : vector<128xf32>
    %50 = vector.multi_reduction <add>, %49, %cst_19 [0] : vector<128x128xf32> to vector<128xf32>
    %51 = vector.shape_cast %50 : vector<128xf32> to vector<1x128xf32>
    %52 = math.log %51 : vector<1x128xf32>
    %53 = arith.addf %46, %52 : vector<1x128xf32>
    %54 = vector.shape_cast %53 : vector<1x128xf32> to vector<1x1x128xf32>
    %c0_20 = arith.constant 0 : index
    %c0_21 = arith.constant 0 : index
    %c0_22 = arith.constant 0 : index
    %55 = vector.load %arg6[%c0_20, %c0_21, %c0_22] : memref<1x1x128xf32, #tpu.memory_space<vmem>>, vector<1x1x128xf32>
    tpu.vector_store %arg6[%c0_20, %c0_21, %c0_22], %54 {strides = array<i32>} : memref<1x1x128xf32, #tpu.memory_space<vmem>>, vector<1x1x128xf32>,
    %c128_i32_23 = arith.constant 128 : i32
    %56 = arith.muli %arg1, %c128_i32_23 : i32
    %c1_i32 = arith.constant 1 : i32
    %57 = arith.addi %arg0, %c1_i32 : i32
    %c128_i32_24 = arith.constant 128 : i32
    %58 = arith.muli %57, %c128_i32_24 : i32
    %59 = arith.cmpi slt, %56, %58 : i32
    %c128_i32_25 = arith.constant 128 : i32
    %60 = arith.muli %arg0, %c128_i32_25 : i32
    %c1_i32_26 = arith.constant 1 : i32
    %61 = arith.addi %arg1, %c1_i32_26 : i32
    %c128_i32_27 = arith.constant 128 : i32
    %62 = arith.muli %61, %c128_i32_27 : i32
    %63 = arith.cmpi slt, %60, %62 : i32
    %64 = arith.andi %59, %63 : i1
    %65 = arith.extui %64 : i1 to i32
    %c0_i32_28 = arith.constant 0 : i32
    %66 = arith.cmpi ne, %65, %c0_i32_28 : i32
    scf.if %66 {
      %70 = vector.broadcast %12 : vector<128x1xi32> to vector<128x128xi32>
      %71 = vector.broadcast %16 : vector<1x128xi32> to vector<128x128xi32>
      %72 = arith.cmpi eq, %70, %71 : vector<128x128xi32>
      %73 = arith.extui %72 : vector<128x128xi1> to vector<128x128xi32>
      %74 = arith.sitofp %73 : vector<128x128xi32> to vector<128x128xf32>
      %c0_31 = arith.constant 0 : index
      %c0_32 = arith.constant 0 : index
      %75 = vector.load %arg10[%c0_31, %c0_32] : memref<128x1xf32, #tpu.memory_space<vmem>>, vector<128x1xf32>
      %76 = arith.mulf %74, %8 : vector<128x128xf32>
      %cst_33 = arith.constant dense<0.000000e+00> : vector<128xf32>
      %77 = vector.multi_reduction <add>, %76, %cst_33 [1] : vector<128x128xf32> to vector<128xf32>
      %78 = vector.shape_cast %77 : vector<128xf32> to vector<128x1xf32>
      %79 = arith.addf %75, %78 : vector<128x1xf32>
      %c0_34 = arith.constant 0 : index
      %c0_35 = arith.constant 0 : index
      %80 = vector.load %arg10[%c0_34, %c0_35] : memref<128x1xf32, #tpu.memory_space<vmem>>, vector<128x1xf32>
      tpu.vector_store %arg10[%c0_34, %c0_35], %79 {strides = array<i32>} : memref<128x1xf32, #tpu.memory_space<vmem>>, vector<128x1xf32>,
    } else {
    }
    %c1_i32_29 = arith.constant 1 : i32
    %67 = arith.cmpi eq, %arg1, %c1_i32_29 : i32
    %68 = arith.extui %67 : i1 to i32
    %c0_i32_30 = arith.constant 0 : i32
    %69 = arith.cmpi ne, %68, %c0_i32_30 : i32
    scf.if %69 {
      %c0_31 = arith.constant 0 : index
      %c0_32 = arith.constant 0 : index
      %70 = vector.load %arg8[%c0_31, %c0_32] : memref<128x1xf32, #tpu.memory_space<vmem>>, vector<128x1xf32>
      %c0_33 = arith.constant 0 : index
      %c0_34 = arith.constant 0 : index
      %71 = vector.load %arg9[%c0_33, %c0_34] : memref<128x1xf32, #tpu.memory_space<vmem>>, vector<128x1xf32>
      %72 = math.log %71 : vector<128x1xf32>
      %73 = arith.addf %70, %72 : vector<128x1xf32>
      %c0_35 = arith.constant 0 : index
      %c0_36 = arith.constant 0 : index
      %74 = vector.load %arg10[%c0_35, %c0_36] : memref<128x1xf32, #tpu.memory_space<vmem>>, vector<128x1xf32>
      %cst_37 = arith.constant 2.000000e+00 : f32
      %75 = vector.broadcast %cst_37 : f32 to vector<128x1xf32>
      %76 = arith.mulf %75, %74 : vector<128x1xf32>
      %77 = arith.subf %73, %76 : vector<128x1xf32>
      %c0_38 = arith.constant 0 : index
      %c0_39 = arith.constant 0 : index
      %78 = vector.load %arg5[%c0_38, %c0_39] : memref<128x1xf32, #tpu.memory_space<vmem>>, vector<128x1xf32>
      tpu.vector_store %arg5[%c0_38, %c0_39], %77 {strides = array<i32>} : memref<128x1xf32, #tpu.memory_space<vmem>>, vector<128x1xf32>,
    } else {
    }
    return
  }
  func.func @transform_0(%arg0: i32, %arg1: i32) -> i32 {
    %c0_i32 = arith.constant 0 : i32
    %c0_i32_0 = arith.constant 0 : i32
    return %c0_i32 : i32
  }
  func.func @transform_1(%arg0: i32, %arg1: i32) -> (i32, i32) {
    %c0_i32 = arith.constant 0 : i32
    %c0_i32_0 = arith.constant 0 : i32
    return %arg0, %c0_i32 : i32, i32
  }
  func.func @transform_2(%arg0: i32, %arg1: i32) -> (i32, i32) {
    %c0_i32 = arith.constant 0 : i32
    %c0_i32_0 = arith.constant 0 : i32
    %c0_i32_1 = arith.constant 0 : i32
    return %c0_i32, %c0_i32_0 : i32, i32
  }
  func.func @transform_3(%arg0: i32, %arg1: i32) -> (i32, i32) {
    %c0_i32 = arith.constant 0 : i32
    %c0_i32_0 = arith.constant 0 : i32
    return %arg0, %c0_i32 : i32, i32
  }
  func.func @transform_4(%arg0: i32, %arg1: i32) -> (i32, i32, i32) {
    %c0_i32 = arith.constant 0 : i32
    %c0_i32_0 = arith.constant 0 : i32
    return %arg0, %c0_i32, %arg1 : i32, i32, i32
  }
}

</mosaic_0001>

<bundles_post_ra>
// kernel: tpu_custom_call.1
= control target key start
LH: loop header
LB: loop body
LE: loop exit
PB: predicated region body
PF: predicated region fallthrough
CT: control target
= control target key end

     0   :  { %s4801_s0 = inlined_call_operand.<no memory space> [shape: f32[1], index: 0, kind: input, shape index: {}]   ;;  %s4802_s1 = inlined_call_operand.vmem [shape: f32[256,64], index: 1, kind: input, shape index: {}]   ;;  %s4803_s2 = inlined_call_operand.vmem [shape: f32[64,256], index: 2, kind: input, shape index: {}]   ;;  %s4804_s3 = inlined_call_operand.vmem [shape: f32[256,1], index: 3, kind: output, shape index: {0}]   ;;  %s4805_s4 = inlined_call_operand.hbm [shape: f32[2,1,256], index: 4, kind: output, shape index: {1}]  }
   0x1   :  { %10 = sst [smem:[#allocation6]] %s4801_s0 }
   0x2   :  { %11 = vsyncpa [#allocation8], 0 }
   0x3   :  { %13 = vsyncpa [#allocation8 + $0x1], 0  ;;  %s3516_s17 = smov 0   ;;  %s3518_s18 = smov 0  }
   0x4   :  { %s3520_s19 = smov 0   ;;  %s3522_s20 = smov 0  }
   0x5   :  { %s3524_s21 = smov 0   ;;  %s3526_s22 = smov 0  }
   0x6   :  { %s3528_s23 = smov 0   ;;  %s3530_s24 = smov 0  }
   0x7 LB: > { %s2580_s0 = sadd.s32 4294967295, %s3481_s24   ;;  %s2581_s25 = sadd.s32 4294967294, %s3481_s24   ;;  %s3481_s24 = sphi %s3530_s24, %s19_s24   ;;  %s3477_s23 = sphi %s3528_s23, %s4936_s23   ;;  %s3473_s22 = sphi %s3526_s22, %s4935_s22   ;;  %s3469_s21 = sphi %s3524_s21, %s4934_s21   ;;  %s3465_s20 = sphi %s3522_s20, %s4933_s20   ;;  %s3461_s19 = sphi %s3520_s19, %s4932_s19   ;;  %s3457_s18 = sphi %s3518_s18, %s4931_s18   ;;  %s3453_s17 = sphi %s3516_s17, %s4930_s17  }
   0x8   : > { %s28_s26 = sadd.s32 1, %s3473_s22  ;;  %s31_s27 = sadd.s32 1, %s3477_s23 }
   0x9   : > { %p29_p0 = scmp.ge.s32.totalorder %s28_s26, 2  ;;  %p144_p1 = scmp.ne.s32.totalorder %s3461_s19, %s3457_s18 }
   0xa   : > { %p145_p2 = scmp.eq.s32.totalorder %s2580_s0, 3  ;;  %p150_p5 = scmp.ne.s32.totalorder %s3457_s18, %s3453_s17 }
   0xb   : > { %s4938_s26 = smov (%p29_p0, %s28_s26), 0  ;;  %s4940_s27 = smov (!%p29_p0, %s31_s27), %s3477_s23 }
   0xc   : > { %s130_s28 = ssub.s32 %s3473_s22, %s4938_s26  ;;  %p3567_p3 = por %p145_p2, %p144_p1 }
   0xd   : > { %p33_p4 = scmp.ge.s32.totalorder %s4940_s27, 2  ;;  %p151_p6 = scmp.eq.s32.totalorder %s2581_s25, 3 }
   0xe   : > { %p2584_p7 = scmp.ge.s32.totalorder %s3481_s24, 1  ;;  %p184_p9 = scmp.lt.s32.totalorder %s3481_s24, 5 }
   0xf   : > { %s4942_s27 = smov (%p33_p4, %s4940_s27), 0  ;;  %p3576_p8 = por %p151_p6, %p150_p5 }
  0x10   : > { %s129_s5 = ssub.s32 %s3477_s23, %s4942_s27  ;;  %s134_s6 = sadd.s32 1, %s3461_s19 }
  0x11   : > { %s131_s7 = sor.u32 %s130_s28, %s129_s5  ;;  %p185_p10 = pnand %p2584_p7, %p184_p9 }
  0x12   : > { %p132_p11 = scmp.eq.s32.totalorder %s131_s7, 0 }
  0x13   : > { %188 = sbr.rel (%p185_p10) target bundleno = 1050 (0x41a), region = 32 }
  0x14   : > { %s3585_s8 = scalar_select %p132_p11, %s3461_s19, %s134_s6  }
  0x1a   : > { %s212_s9 = sand.u32 1, %s3457_s18   ;;  %s2585_s10 = sshll.u32 %s3469_s21, 4 }
  0x1b   : > { %p215_p12 = scmp.lt.s32.totalorder %s2585_s10, 31  ;;  %s3601_s25 = scalar_lea.vmem [#allocation7], %s212_s9 }
  0x1c   : > { %p2589_p13 = scmp.ne.s32.totalorder %s3465_s20, 0 }
  0x1d   : > { %s4944_s10 = smov (!%p215_p12, %s2585_s10), 31  ;;  %s3604_s28 = sld [smem:[#allocation6]] (!%p2589_p13)  ;;  %vm281_vm0 = vcmask (!%p2589_p13), 7168   ;;  %v3483_v1 = vmov (!%p2589_p13), -1e+30   ;;  %v3484_v5 = vmov (!%p2589_p13), 0.0  }
  0x1e   : > { %s2586_s11 = sshll.u32 %s4944_s10, 3  ;;  %229 = sbr.rel (%p2589_p13) target bundleno = 62 (0x3e), region = 36  ;;  %282 = vst.msk [vmem:[#allocation3] sm:$0xff] (!%p2589_p13), %vm281_vm0, %v3483_v1  ;;  %283 = vst.msk [vmem:[#allocation3 + $0x8] sm:$0xff] (!%p2589_p13), %vm281_vm0, %v3483_v1  ;;  %vm264_vm1 = vcmask (!%p2589_p13), 523264  }
  0x1f   : > { %s3592_s14 = scalar_lea.vmem %s4802_s1, %s2586_s11  ;;  %s3597_s0 = scalar_lea.vmem %s4804_s3, %s2586_s11  ;;  %284 = vst.msk [vmem:[#allocation3 + $0x10] sm:$0xff] (!%p2589_p13), %vm281_vm0, %v3483_v1  ;;  %285 = vst.msk [vmem:[#allocation3 + $0x18] sm:$0xff] (!%p2589_p13), %vm281_vm0, %v3483_v1 }
  0x20   : > { %v3607_v0 = vld [vmem:[%s3592_s14] sm:$0xff] (!%p2589_p13)  ;;  %286 = vst.msk [vmem:[#allocation3 + $0x20] sm:$0xff] (!%p2589_p13), %vm281_vm0, %v3483_v1  ;;  %287 = vst.msk [vmem:[#allocation3 + $0x28] sm:$0xff] (!%p2589_p13), %vm281_vm0, %v3483_v1  ;;  %v231_v2 = vld [vmem:[%s3592_s14 + $0x8] sm:$0xff] (!%p2589_p13) }
  0x21   : > { %288 = vst.msk [vmem:[#allocation3 + $0x30] sm:$0xff] (!%p2589_p13), %vm281_vm0, %v3483_v1  ;;  %289 = vst.msk [vmem:[#allocation3 + $0x38] sm:$0xff] (!%p2589_p13), %vm281_vm0, %v3483_v1  ;;  %v232_v3 = vld [vmem:[%s3592_s14 + $0x10] sm:$0xff] (!%p2589_p13)  ;;  %v233_v4 = vld [vmem:[%s3592_s14 + $0x18] sm:$0xff] (!%p2589_p13) }
  0x22   : > { %290 = vst.msk [vmem:[#allocation3 + $0x40] sm:$0xff] (!%p2589_p13), %vm281_vm0, %v3483_v1  ;;  %291 = vst.msk [vmem:[#allocation3 + $0x48] sm:$0xff] (!%p2589_p13), %vm281_vm0, %v3483_v1  ;;  %v234_v6 = vld [vmem:[%s3592_s14 + $0x20] sm:$0xff] (!%p2589_p13)  ;;  %v235_v7 = vld [vmem:[%s3592_s14 + $0x28] sm:$0xff] (!%p2589_p13) }
  0x23   : > { %292 = vst.msk [vmem:[#allocation3 + $0x50] sm:$0xff] (!%p2589_p13), %vm281_vm0, %v3483_v1  ;;  %293 = vst.msk [vmem:[#allocation3 + $0x58] sm:$0xff] (!%p2589_p13), %vm281_vm0, %v3483_v1  ;;  %v236_v8 = vld [vmem:[%s3592_s14 + $0x30] sm:$0xff] (!%p2589_p13)  ;;  %v237_v9 = vld [vmem:[%s3592_s14 + $0x38] sm:$0xff] (!%p2589_p13)  ;;  %v247_v12 = vstv (!%p2589_p13), %s3604_s28 }
  0x24   : > { %294 = vst.msk [vmem:[#allocation3 + $0x60] sm:$0xff] (!%p2589_p13), %vm281_vm0, %v3483_v1  ;;  %295 = vst.msk [vmem:[#allocation3 + $0x68] sm:$0xff] (!%p2589_p13), %vm281_vm0, %v3483_v1  ;;  %v238_v10 = vld [vmem:[%s3592_s14 + $0x40] sm:$0xff] (!%p2589_p13)  ;;  %v239_v11 = vld [vmem:[%s3592_s14 + $0x48] sm:$0xff] (!%p2589_p13)  ;;  %v248_v16 = vmul.f32 (!%p2589_p13), %v247_v12, %v3607_v0  ;;  %v249_v17 = vmul.f32 (!%p2589_p13), %v247_v12, %v231_v2  ;;  %v250_v18 = vmul.f32 (!%p2589_p13), %v247_v12, %v232_v3 }
  0x25   : > { %296 = vst.msk [vmem:[#allocation3 + $0x70] sm:$0xff] %vm281_vm0, %v3483_v1  ;;  %297 = vst.msk [vmem:[#allocation3 + $0x78] sm:$0xff] %vm281_vm0, %v3483_v1  ;;  %v240_v13 = vld [vmem:[%s3592_s14 + $0x50] sm:$0xff]  ;;  %v241_v14 = vld [vmem:[%s3592_s14 + $0x58] sm:$0xff]  ;;  %v251_v19 = vmul.f32 %v247_v12, %v233_v4  ;;  %v252_v23 = vmul.f32 %v247_v12, %v234_v6  ;;  %v253_v24 = vmul.f32 %v247_v12, %v235_v7 }
  0x26   : > { %298 = vst.msk [vmem:[#allocation4] sm:$0xff] %vm281_vm0, %v3484_v5  ;;  %299 = vst.msk [vmem:[#allocation4 + $0x8] sm:$0xff] %vm281_vm0, %v3484_v5  ;;  %v242_v15 = vld [vmem:[%s3592_s14 + $0x60] sm:$0xff]  ;;  %v243_v20 = vld [vmem:[%s3592_s14 + $0x68] sm:$0xff]  ;;  %v254_v25 = vmul.f32 %v247_v12, %v236_v8  ;;  %v255_v26 = vmul.f32 %v247_v12, %v237_v9  ;;  %v256_v27 = vmul.f32 %v247_v12, %v238_v10 }
  0x27   : > { %300 = vst.msk [vmem:[#allocation4 + $0x10] sm:$0xff] %vm281_vm0, %v3484_v5  ;;  %301 = vst.msk [vmem:[#allocation4 + $0x18] sm:$0xff] %vm281_vm0, %v3484_v5  ;;  %v244_v21 = vld [vmem:[%s3592_s14 + $0x70] sm:$0xff]  ;;  %v245_v22 = vld [vmem:[%s3592_s14 + $0x78] sm:$0xff]  ;;  %v257_v28 = vmul.f32 %v247_v12, %v239_v11  ;;  %v258_v29 = vmul.f32 %v247_v12, %v240_v13  ;;  %v259_v30 = vmul.f32 %v247_v12, %v241_v14 }
  0x28   : > { %302 = vst.msk [vmem:[#allocation4 + $0x20] sm:$0xff] %vm281_vm0, %v3484_v5  ;;  %303 = vst.msk [vmem:[#allocation4 + $0x28] sm:$0xff] %vm281_vm0, %v3484_v5  ;;  %v260_v31 = vmul.f32 %v247_v12, %v242_v15  ;;  %v261_v32 = vmul.f32 %v247_v12, %v243_v20  ;;  %v262_v33 = vmul.f32 %v247_v12, %v244_v21 }
  0x29   : > { %304 = vst.msk [vmem:[#allocation4 + $0x30] sm:$0xff] %vm281_vm0, %v3484_v5  ;;  %305 = vst.msk [vmem:[#allocation4 + $0x38] sm:$0xff] %vm281_vm0, %v3484_v5  ;;  %v263_v34 = vmul.f32 %v247_v12, %v245_v22 }
  0x2a   : > { %306 = vst.msk [vmem:[#allocation4 + $0x40] sm:$0xff] %vm281_vm0, %v3484_v5  ;;  %307 = vst.msk [vmem:[#allocation4 + $0x48] sm:$0xff] %vm281_vm0, %v3484_v5 }
  0x2b   : > { %308 = vst.msk [vmem:[#allocation4 + $0x50] sm:$0xff] %vm281_vm0, %v3484_v5  ;;  %309 = vst.msk [vmem:[#allocation4 + $0x58] sm:$0xff] %vm281_vm0, %v3484_v5 }
  0x2c   : > { %310 = vst.msk [vmem:[#allocation4 + $0x60] sm:$0xff] %vm281_vm0, %v3484_v5  ;;  %311 = vst.msk [vmem:[#allocation4 + $0x68] sm:$0xff] %vm281_vm0, %v3484_v5 }
  0x2d   : > { %312 = vst.msk [vmem:[#allocation4 + $0x70] sm:$0xff] %vm281_vm0, %v3484_v5  ;;  %313 = vst.msk [vmem:[#allocation4 + $0x78] sm:$0xff] %vm281_vm0, %v3484_v5 }
  0x2e   : > { %314 = vst.msk [vmem:[#allocation5] sm:$0xff] %vm281_vm0, %v3484_v5  ;;  %315 = vst.msk [vmem:[#allocation5 + $0x8] sm:$0xff] %vm281_vm0, %v3484_v5 }
  0x2f   : > { %316 = vst.msk [vmem:[#allocation5 + $0x10] sm:$0xff] %vm281_vm0, %v3484_v5  ;;  %317 = vst.msk [vmem:[#allocation5 + $0x18] sm:$0xff] %vm281_vm0, %v3484_v5 }
  0x30   : > { %318 = vst.msk [vmem:[#allocation5 + $0x20] sm:$0xff] %vm281_vm0, %v3484_v5  ;;  %319 = vst.msk [vmem:[#allocation5 + $0x28] sm:$0xff] %vm281_vm0, %v3484_v5 }
  0x31   : > { %320 = vst.msk [vmem:[#allocation5 + $0x30] sm:$0xff] %vm281_vm0, %v3484_v5  ;;  %321 = vst.msk [vmem:[#allocation5 + $0x38] sm:$0xff] %vm281_vm0, %v3484_v5 }
  0x32   : > { %322 = vst.msk [vmem:[#allocation5 + $0x40] sm:$0xff] %vm281_vm0, %v3484_v5  ;;  %323 = vst.msk [vmem:[#allocation5 + $0x48] sm:$0xff] %vm281_vm0, %v3484_v5 }
  0x33   : > { %324 = vst.msk [vmem:[#allocation5 + $0x50] sm:$0xff] %vm281_vm0, %v3484_v5  ;;  %325 = vst.msk [vmem:[#allocation5 + $0x58] sm:$0xff] %vm281_vm0, %v3484_v5 }
  0x34   : > { %326 = vst.msk [vmem:[#allocation5 + $0x60] sm:$0xff] %vm281_vm0, %v3484_v5  ;;  %327 = vst.msk [vmem:[#allocation5 + $0x68] sm:$0xff] %vm281_vm0, %v3484_v5 }
  0x35   : > { %328 = vst.msk [vmem:[#allocation5 + $0x70] sm:$0xff] %vm281_vm0, %v3484_v5  ;;  %329 = vst.msk [vmem:[#allocation5 + $0x78] sm:$0xff] %vm281_vm0, %v3484_v5 }
  0x36   : > { %265 = vst.msk [vmem:[#allocation2] sm:$0xff] %vm264_vm1, %v248_v16  ;;  %266 = vst.msk [vmem:[#allocation2 + $0x8] sm:$0xff] %vm264_vm1, %v249_v17 }
  0x37   : > { %267 = vst.msk [vmem:[#allocation2 + $0x10] sm:$0xff] %vm264_vm1, %v250_v18  ;;  %268 = vst.msk [vmem:[#allocation2 + $0x18] sm:$0xff] %vm264_vm1, %v251_v19 }
  0x38   : > { %269 = vst.msk [vmem:[#allocation2 + $0x20] sm:$0xff] %vm264_vm1, %v252_v23  ;;  %270 = vst.msk [vmem:[#allocation2 + $0x28] sm:$0xff] %vm264_vm1, %v253_v24 }
  0x39   : > { %271 = vst.msk [vmem:[#allocation2 + $0x30] sm:$0xff] %vm264_vm1, %v254_v25  ;;  %272 = vst.msk [vmem:[#allocation2 + $0x38] sm:$0xff] %vm264_vm1, %v255_v26 }
  0x3a   : > { %273 = vst.msk [vmem:[#allocation2 + $0x40] sm:$0xff] %vm264_vm1, %v256_v27  ;;  %274 = vst.msk [vmem:[#allocation2 + $0x48] sm:$0xff] %vm264_vm1, %v257_v28 }
  0x3b   : > { %275 = vst.msk [vmem:[#allocation2 + $0x50] sm:$0xff] %vm264_vm1, %v258_v29  ;;  %276 = vst.msk [vmem:[#allocation2 + $0x58] sm:$0xff] %vm264_vm1, %v259_v30 }
  0x3c   : > { %277 = vst.msk [vmem:[#allocation2 + $0x60] sm:$0xff] %vm264_vm1, %v260_v31  ;;  %278 = vst.msk [vmem:[#allocation2 + $0x68] sm:$0xff] %vm264_vm1, %v261_v32 }
  0x3d   : > { %279 = vst.msk [vmem:[#allocation2 + $0x70] sm:$0xff] %vm264_vm1, %v262_v33  ;;  %280 = vst.msk [vmem:[#allocation2 + $0x78] sm:$0xff] %vm264_vm1, %v263_v34 }
  0x3e PF: > { %s3691_s5 = sshll.u32 %s3465_s20, 7  ;;  %s3694_s6 = sshll.u32 %s3469_s21, 7  ;;  %v343_v35 = vld [vmem:[#allocation2] sm:$0xff]  ;;  %vm359_vm2 = vcmask 523264   ;;  %v344_v36 = vld [vmem:[#allocation2 + $0x8] sm:$0xff]  ;;  %v345_v37 = vld [vmem:[#allocation2 + $0x10] sm:$0xff] }
  0x3f   : > { %s331_s7 = sshra.s32 %s3691_s5, 7  ;;  %s2617_s10 = sadd.s32 128, %s3694_s6  ;;  %v361_v38 = vsel %vm359_vm2, %v343_v35, 0  ;;  %v364_v39 = vsel %vm359_vm2, %v344_v36, 0  ;;  %v346_v40 = vld [vmem:[#allocation2 + $0x18] sm:$0xff]  ;;  %v367_v43 = vsel %vm359_vm2, %v345_v37, 0 }
  0x40   : > { %s2591_s11 = sshll.u32 %s331_s7, 3  ;;  %p3701_p0 = scmp.lt.s32.totalorder %s3691_s5, %s2617_s10  ;;  %v3705_v41 = vand.u32 4294901760, %v361_v38  ;;  %v3707_v42 = vand.u32 4294901760, %v364_v39  ;;  %v347_v44 = vld [vmem:[#allocation2 + $0x20] sm:$0xff]  ;;  %v348_v45 = vld [vmem:[#allocation2 + $0x28] sm:$0xff]  ;;  %v370_v51 = vsel %vm359_vm2, %v346_v40, 0 }
  0x41   : > { %s334_s15 = scalar_lea.vmem %s4803_s2, %s2591_s11  ;;  %s2619_s16 = sadd.s32 128, %s3691_s5  ;;  %v3740_v63 = vand.u32 4294901760, %v367_v43  ;;  %v373_v2 = vsel %vm359_vm2, %v347_v44, 0  ;;  %v376_v3 = vsel %vm359_vm2, %v348_v45, 0  ;;  %v3759_v11 = vand.u32 4294901760, %v370_v51  ;;  %v349_v28 = vld [vmem:[#allocation2 + $0x30] sm:$0xff] }
  0x42   : > { %v335_v46 = vld [vmem:[%s334_s15] sm:$0xff]  ;;  %v336_v47 = vld [vmem:[%s334_s15 + $0x10] sm:$0xff]  ;;  %p3715_p1 = scmp.lt.s32.totalorder %s3694_s6, %s2619_s16  ;;  %v3720_v49 = vsub.f32 %v361_v38, %v3705_v41  ;;  %v3723_v50 = vsub.f32 %v364_v39, %v3707_v42  ;;  %v3773_v15 = vand.u32 4294901760, %v373_v2  ;;  %v3781_v19 = vand.u32 4294901760, %v376_v3  ;;  %v350_v37 = vld [vmem:[#allocation2 + $0x38] sm:$0xff] }
  0x43   : > { %v337_v48 = vld [vmem:[%s334_s15 + $0x20] sm:$0xff]  ;;  %v409_v52 = vand.u32 4294901760, %v335_v46  ;;  %v412_v53 = vand.u32 4294901760, %v336_v47  ;;  %v338_v54 = vld [vmem:[%s334_s15 + $0x30] sm:$0xff]  ;;  %v3771_v14 = vsub.f32 %v367_v43, %v3740_v63  ;;  %v3779_v18 = vsub.f32 %v370_v51, %v3759_v11 }
  0x44   : > { %v415_v55 = vand.u32 4294901760, %v337_v48  ;;  %v3726_v56 = vld [vmem:[%s334_s15 + $0x40] sm:$0xff]  ;;  %v3728_v57 = vld [vmem:[%s334_s15 + $0x50] sm:$0xff]  ;;  %p2165_p2 = pnand %p3715_p1, %p3701_p0  ;;  %v418_v58 = vand.u32 4294901760, %v338_v54  ;;  %v483_v1 = vand.u32 4294901760, %v3720_v49  ;;  %v493_v6 = vand.u32 4294901760, %v3723_v50 }
  0x45   : > { %v421_v59 = vand.u32 4294901760, %v3726_v56  ;;  %v424_v60 = vand.u32 4294901760, %v3728_v57  ;;  %v3736_v61 = vld [vmem:[%s334_s15 + $0x60] sm:$0xff]  ;;  %v3738_v62 = vld [vmem:[%s334_s15 + $0x70] sm:$0xff]  ;;  %v3742_v0 = vpack.c.bf16 %v412_v53, %v409_v52  ;;  %v3751_v7 = vsub.f32 %v335_v46, %v409_v52 }
  0x46   : > { %v3747_v4 = vpack.c.bf16 %v418_v58, %v415_v55  ;;  %v427_v5 = vand.u32 4294901760, %v3736_v61  ;;  %v430_v8 = vand.u32 4294901760, %v3738_v62  ;;  %v484_v9 = vsub.f32 %v3720_v49, %v483_v1  ;;  %2900 = vmatprep.mubr.f32.mxu0 %v483_v1 }
  0x47   : > { %3005 = vmatprep.subr.bf16.mxu1 %v3742_v0  ;;  %3053 = vmatprep.subr.bf16.mxu0 %v3742_v0  ;;  %v3757_v10 = vsub.f32 %v336_v47, %v412_v53  ;;  %v3767_v12 = vpack.c.bf16 %v424_v60, %v421_v59  ;;  %v644_v13 = vand.u32 4294901760, %v3751_v7  ;;  %v3786_v20 = vsub.f32 %v3723_v50, %v493_v6  ;;  %v351_v47 = vld [vmem:[#allocation2 + $0x40] sm:$0xff] }
  0x48   : > { %3007 = vmatpush3.bf16.msra.mxu1 %v3742_v0  ;;  %3055 = vmatpush3.bf16.msra.mxu0 %v3742_v0  ;;  %v485_v16 = vand.u32 4294901760, %v484_v9  ;;  %v503_v22 = vand.u32 4294901760, %v3771_v14  ;;  %v3791_v23 = vsub.f32 %v373_v2, %v3773_v15  ;;  %v3797_v24 = vpack.c.bf16 %v430_v8, %v427_v5 }
  0x49   : > { %3009 = vmatprep.subr.bf16.mxu1 %v3747_v4  ;;  %3057 = vmatprep.subr.bf16.mxu0 %v3747_v4  ;;  %v651_v17 = vand.u32 4294901760, %v3757_v10  ;;  %v645_v21 = vsub.f32 %v3751_v7, %v644_v13  ;;  %v513_v26 = vand.u32 4294901760, %v3779_v18  ;;  %v3802_v27 = vsub.f32 %v376_v3, %v3781_v19  ;;  %v353_v3 = vld [vmem:[#allocation2 + $0x50] sm:$0xff] }
  0x4a   : > { %2780 = vmatprep.mubr.f32.mxu1 %v485_v16  ;;  %v3809_v30 = vsub.f32 %v3771_v14, %v503_v22  ;;  %v523_v31 = vand.u32 4294901760, %v3791_v23  ;;  %v3812_v32 = vsub.f32 %v337_v48, %v415_v55  ;;  %v3822_v36 = vsub.f32 %v338_v54, %v418_v58  ;;  %v352_v48 = vld [vmem:[#allocation2 + $0x48] sm:$0xff] }
  0x4b   : > { %v652_v25 = vsub.f32 %v3757_v10, %v651_v17  ;;  %v646_v29 = vand.u32 4294901760, %v645_v21  ;;  %v3819_v34 = vsub.f32 %v3779_v18, %v513_v26  ;;  %v533_v35 = vand.u32 4294901760, %v3802_v27 }
  0x4c   : > { %3011 = vmatpush3.bf16.msra.mxu1 %v3747_v4  ;;  %3059 = vmatpush3.bf16.msra.mxu0 %v3747_v4  ;;  %v495_v38 = vand.u32 4294901760, %v3786_v20  ;;  %v658_v39 = vand.u32 4294901760, %v3812_v32  ;;  %v379_v40 = vsel %vm359_vm2, %v349_v28, 0  ;;  %v3068_v43 = vpack.c.bf16 %v651_v17, %v644_v13 }
  0x4d   : > { %3013 = vmatprep.subr.bf16.mxu1 %v3767_v12  ;;  %3061 = vmatprep.subr.bf16.mxu0 %v3767_v12  ;;  %v653_v33 = vand.u32 4294901760, %v652_v25  ;;  %v505_v44 = vand.u32 4294901760, %v3809_v30  ;;  %v3831_v45 = vsub.f32 %v3791_v23, %v523_v31  ;;  %v665_v46 = vand.u32 4294901760, %v3822_v36 }
  0x4e   : > { %v659_v52 = vsub.f32 %v3812_v32, %v658_v39  ;;  %v3837_v53 = vand.u32 4294901760, %v379_v40  ;;  %v382_v54 = vsel %vm359_vm2, %v350_v37, 0  ;;  %v515_v55 = vand.u32 4294901760, %v3819_v34  ;;  %v354_v37 = vld [vmem:[#allocation2 + $0x58] sm:$0xff] }
  0x4f   : > { %v3020_v51 = vpack.c.bf16 %v653_v33, %v646_v29  ;;  %v3846_v58 = vsub.f32 %v3802_v27, %v533_v35  ;;  %v666_v1 = vsub.f32 %v3822_v36, %v665_v46  ;;  %v3849_v2 = vand.u32 4294901760, %v382_v54 }
  0x50   : > { %3015 = vmatpush3.bf16.msra.mxu1 %v3767_v12  ;;  %3063 = vmatpush3.bf16.msra.mxu0 %v3767_v12  ;;  %v660_v9 = vand.u32 4294901760, %v659_v52  ;;  %v3852_v13 = vsub.f32 %v379_v40, %v3837_v53  ;;  %v385_v16 = vsel %vm359_vm2, %v351_v47, 0  ;;  %v388_v17 = vsel %vm359_vm2, %v352_v48, 0 }
  0x51   : > { %3017 = vmatprep.subr.bf16.mxu1 %v3797_v24  ;;  %3065 = vmatprep.subr.bf16.mxu0 %v3797_v24  ;;  %v667_v20 = vand.u32 4294901760, %v666_v1  ;;  %v3857_v21 = vsub.f32 %v382_v54, %v3849_v2  ;;  %v3859_v25 = vand.u32 4294901760, %v385_v16  ;;  %v3861_v28 = vand.u32 4294901760, %v388_v17 }
  0x52   : > { %v4808_v29 = vand.u32 4294901760, %v3852_v13  ;;  %v3869_v30 = vsub.f32 %v3726_v56, %v421_v59  ;;  %v3874_v33 = vsub.f32 %v3728_v57, %v424_v60  ;;  %v391_v34 = vsel %vm359_vm2, %v353_v3, 0  ;;  %v355_v3 = vld [vmem:[#allocation2 + $0x60] sm:$0xff] }
  0x53   : > { %v3072_v40 = vpack.c.bf16 %v665_v46, %v658_v39  ;;  %v4806_v47 = vand.u32 4294901760, %v3857_v21  ;;  %v3879_v48 = vsub.f32 %v385_v16, %v3859_v25  ;;  %v3882_v52 = vsub.f32 %v388_v17, %v3861_v28 }
  0x54   : > { %3019 = vmatpush3.bf16.msra.mxu1 %v3797_v24  ;;  %3067 = vmatpush3.bf16.msra.mxu0 %v3797_v24  ;;  %v3024_v56 = vpack.c.bf16 %v667_v20, %v660_v9  ;;  %v672_v59 = vand.u32 4294901760, %v3869_v30  ;;  %v679_v57 = vand.u32 4294901760, %v3874_v33  ;;  %v3886_v60 = vand.u32 4294901760, %v391_v34 }
  0x55   : > { %3021 = vmatprep.subr.bf16.mxu1 %v3020_v51  ;;  %3069 = vmatprep.subr.bf16.mxu0 %v3068_v43  ;;  %v544_v39 = vsub.f32 %v3852_v13, %v4808_v29  ;;  %v3896_v46 = vsub.f32 %v3857_v21, %v4806_v47  ;;  %v4807_v54 = vand.u32 4294901760, %v3879_v48  ;;  %v394_v1 = vsel %vm359_vm2, %v354_v37, 0  ;;  %v358_v29 = vld [vmem:[#allocation2 + $0x78] sm:$0xff] }
  0x56   : > { %v673_v9 = vsub.f32 %v3869_v30, %v672_v59  ;;  %v680_v16 = vsub.f32 %v3874_v33, %v679_v57  ;;  %v4809_v20 = vand.u32 4294901760, %v3882_v52  ;;  %v3913_v47 = vand.u32 4294901760, %v394_v1 }
  0x57   : > { %2781 = vmatmul.mubr.f32.vlgmr.msra.gmra.mrb[0].mxu1 %v495_v38  ;;  %2901 = vmatmul.mubr.f32.vlgmr.msra.gmra.mrb[0].mxu0 %v493_v6  ;;  %v525_v38 = vand.u32 4294901760, %v3831_v45  ;;  %v535_v6 = vand.u32 4294901760, %v3846_v58  ;;  %v564_v17 = vsub.f32 %v3879_v48, %v4807_v54  ;;  %v356_v45 = vld [vmem:[#allocation2 + $0x68] sm:$0xff]  ;;  %v555_v54 = vand.u32 4294901760, %v3896_v46 }
  0x58   : > { %3023 = vmatpush3.bf16.msra.mxu1 %v3020_v51  ;;  %3071 = vmatpush3.bf16.msra.mxu0 %v3068_v43  ;;  %v3076_v51 = vpack.c.bf16 %v679_v57, %v672_v59  ;;  %v3911_v43 = vsub.f32 %v391_v34, %v3886_v60  ;;  %v674_v58 = vand.u32 4294901760, %v673_v9  ;;  %v681_v37 = vand.u32 4294901760, %v680_v16  ;;  %v357_v57 = vld [vmem:[#allocation2 + $0x70] sm:$0xff] }
  0x59   : > { %2783 = vmatprep.mubr.f32.mxu1 %v505_v44  ;;  %2903 = vmatprep.mubr.f32.mxu0 %v503_v22  ;;  %v397_v44 = vsel %vm359_vm2, %v355_v3, 0  ;;  %v545_v22 = vand.u32 4294901760, %v544_v39  ;;  %v3925_v3 = vsub.f32 %v394_v1, %v3913_v47  ;;  %v574_v39 = vsub.f32 %v3882_v52, %v4809_v20 }
  0x5a   : > { %4846 = vst [vmem:[#allocation10_spill] sm:$0xff] %v3911_v43  ;;  %3025 = vmatprep.subr.bf16.mxu1 %v3024_v56  ;;  %3073 = vmatprep.subr.bf16.mxu0 %v3072_v40  ;;  %v583_v59 = vand.u32 4294901760, %v3911_v43  ;;  %v3920_v34 = vand.u32 4294901760, %v397_v44  ;;  %v3028_v9 = vpack.c.bf16 %v681_v37, %v674_v58  ;;  %v3944_v1 = vsub.f32 %v3738_v62, %v430_v8 }
  0x5b   : > { %2784 = vmatmul.mubr.f32.gmra.mrb[2].mxu1 %v515_v55  ;;  %2904 = vmatmul.mubr.f32.gmra.mrb[2].mxu0 %v513_v26  ;;  %v400_v55 = vsel %vm359_vm2, %v356_v45, 0  ;;  %v3931_v26 = vsub.f32 %v3736_v61, %v427_v5  ;;  %v403_v5 = vsel %vm359_vm2, %v357_v57, 0  ;;  %v593_v16 = vand.u32 4294901760, %v3925_v3 }
  0x5c   : > { %2786 = vmatprep.mubr.f32.mxu1 %v525_v38  ;;  %2906 = vmatprep.mubr.f32.mxu0 %v523_v31  ;;  %v3937_v46 = vsub.f32 %v397_v44, %v3920_v34  ;;  %v3939_v31 = vand.u32 4294901760, %v400_v55  ;;  %v565_v38 = vand.u32 4294901760, %v564_v17  ;;  %v693_v8 = vand.u32 4294901760, %v3944_v1 }
  0x5d   : > { %3027 = vmatpush3.bf16.msra.mxu1 %v3024_v56  ;;  %3075 = vmatpush3.bf16.msra.mxu0 %v3072_v40  ;;  %v686_v61 = vand.u32 4294901760, %v3931_v26  ;;  %v406_v40 = vsel %vm359_vm2, %v358_v29, 0  ;;  %v584_v56 = vsub.f32 %v3911_v43, %v583_v59  ;;  %v4847_v17 = vand.u32 4294901760, %v3852_v13 }
  0x5e   : > { %3029 = vmatprep.subr.bf16.mxu1 %v3028_v9  ;;  %3077 = vmatprep.subr.bf16.mxu0 %v3076_v51  ;;  %v3954_v62 = vsub.f32 %v400_v55, %v3939_v31  ;;  %v603_v45 = vand.u32 4294901760, %v3937_v46  ;;  %v694_v58 = vsub.f32 %v3944_v1, %v693_v8  ;;  %v575_v44 = vand.u32 4294901760, %v574_v39 }
  0x5f   : > { %2787 = vmatmul.mubr.f32.gmra.mrb[4].mxu1 %v535_v6  ;;  %2907 = vmatmul.mubr.f32.gmra.mrb[4].mxu0 %v533_v35  ;;  %v687_v29 = vsub.f32 %v3931_v26, %v686_v61  ;;  %v3961_v6 = vand.u32 4294901760, %v403_v5  ;;  %v3963_v35 = vand.u32 4294901760, %v406_v40  ;;  %v3080_v37 = vpack.c.bf16 %v693_v8, %v686_v61 }
  0x60   : > { %2789 = vmatprep.mubr.f32.mxu1 %v545_v22  ;;  %2909 = vmatprep.mubr.f32.mxu0 %v4847_v17  ;;  %v4848_v55 = vand.u32 4294901760, %v3857_v21  ;;  %v594_v17 = vsub.f32 %v3925_v3, %v593_v16  ;;  %v613_v20 = vand.u32 4294901760, %v3954_v62  ;;  %v695_v43 = vand.u32 4294901760, %v694_v58 }
  0x61   : > { %3031 = vmatpush3.bf16.msra.mxu1 %v3028_v9  ;;  %3079 = vmatpush3.bf16.msra.mxu0 %v3076_v51  ;;  %v688_v57 = vand.u32 4294901760, %v687_v29  ;;  %v3967_v22 = vsub.f32 %v403_v5, %v3961_v6  ;;  %v3974_v9 = vsub.f32 %v406_v40, %v3963_v35  ;;  %v4849_v51 = vand.u32 4294901760, %v3879_v48 }
  0x62   : > { %v585_v39 = vand.u32 4294901760, %v584_v56  ;;  %v604_v61 = vsub.f32 %v3937_v46, %v603_v45  ;;  %3081 = vmatprep.subr.bf16.mxu0 %v3080_v37  ;;  %v4850_v8 = vand.u32 4294901760, %v3882_v52  ;;  %v595_v29 = vand.u32 4294901760, %v594_v17 }
  0x63   : > { %2790 = vmatmul.mubr.f32.gmra.mrb[6].mxu1 %v555_v54  ;;  %2910 = vmatmul.mubr.f32.gmra.mrb[6].mxu0 %v4848_v55  ;;  %v623_v54 = vand.u32 4294901760, %v3967_v22  ;;  %v3032_v5 = vpack.c.bf16 %v695_v43, %v688_v57  ;;  %v614_v40 = vsub.f32 %v3954_v62, %v613_v20  ;;  %v3036_v43 = vpack.c.bf16 %v3757_v10, %v3751_v7 }
  0x64   : > { %2792 = vmatprep.mubr.f32.mxu1 %v565_v38  ;;  %2912 = vmatprep.mubr.f32.mxu0 %v4849_v51  ;;  %v633_v38 = vand.u32 4294901760, %v3974_v9  ;;  %v605_v58 = vand.u32 4294901760, %v604_v61  ;;  %v3040_v7 = vpack.c.bf16 %v3822_v36, %v3812_v32  ;;  %v3044_v10 = vpack.c.bf16 %v3874_v33, %v3869_v30 }
  0x65   : > { %3083 = vmatpush3.bf16.msra.mxu0 %v3080_v37  ;;  %v624_v56 = vsub.f32 %v3967_v22, %v623_v54  ;;  %3033 = vmatprep.subr.bf16.mxu1 %v3032_v5  ;;  %v615_v37 = vand.u32 4294901760, %v614_v40 }
  0x66   : > { %3085 = vmatprep.subr.bf16.mxu0 %v3742_v0  ;;  %3035 = vmatpush3.bf16.msra.mxu1 %v3032_v5 }
  0x67   : > { %2793 = vmatmul.mubr.f32.gmra.mrb[8].mxu1 %v575_v44  ;;  %2913 = vmatmul.mubr.f32.gmra.mrb[8].mxu0 %v4850_v8  ;;  %v634_v44 = vsub.f32 %v3974_v9, %v633_v38  ;;  %v625_v57 = vand.u32 4294901760, %v624_v56 }
  0x68   : > { %2795 = vmatprep.mubr.f32.mxu1 %v585_v39  ;;  %2915 = vmatprep.mubr.f32.mxu0 %v583_v59 }
  0x69   : > { %3037 = vmatprep.subr.bf16.mxu1 %v3036_v43  ;;  %v635_v59 = vand.u32 4294901760, %v634_v44 }
  0x6b   : > { %2796 = vmatmul.mubr.f32.gmra.mrb[10].mxu1 %v595_v29  ;;  %2916 = vmatmul.mubr.f32.gmra.mrb[10].mxu0 %v593_v16 }
  0x6c   : > { %2798 = vmatprep.mubr.f32.mxu1 %v605_v58  ;;  %2918 = vmatprep.mubr.f32.mxu0 %v603_v45 }
  0x6f   : > { %2799 = vmatmul.mubr.f32.gmra.mrb[12].mxu1 %v615_v37  ;;  %2919 = vmatmul.mubr.f32.gmra.mrb[12].mxu0 %v613_v20 }
  0x70   : > { %2801 = vmatprep.mubr.f32.mxu1 %v625_v57  ;;  %2921 = vmatprep.mubr.f32.mxu0 %v623_v54 }
  0x73   : > { %2802 = vmatmul.mubr.f32.gmra.mrb[14].mxu1 %v635_v59  ;;  %2922 = vmatmul.mubr.f32.gmra.mrb[14].mxu0 %v633_v38 }
  0x74   : > { %2820 = vmatprep.mubr.f32.mxu1 %v3705_v41  ;;  %2940 = vmatprep.mubr.f32.mxu0 %v3705_v41 }
  0x77   : > { %2821 = vmatmul.mubr.f32.vlgmr.msra.gmra.mrb[0].mxu1 %v3707_v42  ;;  %2941 = vmatmul.mubr.f32.vlgmr.msra.gmra.mrb[0].mxu0 %v3707_v42 }
  0x78   : > { %3039 = vmatpush3.bf16.msra.mxu1 %v3036_v43  ;;  %3087 = vmatpush3.bf16.msra.mxu0 %v3742_v0  ;;  %v3048_v0 = vpack.c.bf16 %v3944_v1, %v3931_v26 }
  0x79   : > { %2823 = vmatprep.mubr.f32.mxu1 %v3740_v63  ;;  %2943 = vmatprep.mubr.f32.mxu0 %v3740_v63 }
  0x7a   : > { %3041 = vmatprep.subr.bf16.mxu1 %v3040_v7  ;;  %3089 = vmatprep.subr.bf16.mxu0 %v3747_v4 }
  0x7b   : > { %2824 = vmatmul.mubr.f32.gmra.mrb[2].mxu1 %v3759_v11  ;;  %2944 = vmatmul.mubr.f32.gmra.mrb[2].mxu0 %v3759_v11 }
  0x7c   : > { %2826 = vmatprep.mubr.f32.mxu1 %v3773_v15  ;;  %2946 = vmatprep.mubr.f32.mxu0 %v3773_v15 }
  0x7d   : > { %3043 = vmatpush3.bf16.msra.mxu1 %v3040_v7  ;;  %3091 = vmatpush3.bf16.msra.mxu0 %v3747_v4 }
  0x7e   : > { %3045 = vmatprep.subr.bf16.mxu1 %v3044_v10  ;;  %3093 = vmatprep.subr.bf16.mxu0 %v3767_v12 }
  0x7f   : > { %2827 = vmatmul.mubr.f32.gmra.mrb[4].mxu1 %v3781_v19  ;;  %2947 = vmatmul.mubr.f32.gmra.mrb[4].mxu0 %v3781_v19 }
  0x80   : > { %2829 = vmatprep.mubr.f32.mxu1 %v3837_v53  ;;  %2949 = vmatprep.mubr.f32.mxu0 %v3837_v53 }
  0x81   : > { %3047 = vmatpush3.bf16.msra.mxu1 %v3044_v10  ;;  %3095 = vmatpush3.bf16.msra.mxu0 %v3767_v12  ;;  %v4073_v12 = vstv %s3694_s6 }
  0x82   : > { %3049 = vmatprep.subr.bf16.mxu1 %v3048_v0  ;;  %3097 = vmatprep.subr.bf16.mxu0 %v3797_v24 }
  0x83   : > { %2830 = vmatmul.mubr.f32.gmra.mrb[6].mxu1 %v3849_v2  ;;  %2950 = vmatmul.mubr.f32.gmra.mrb[6].mxu0 %v3849_v2 }
  0x84   : > { %2832 = vmatprep.mubr.f32.mxu1 %v3859_v25  ;;  %2952 = vmatprep.mubr.f32.mxu0 %v3859_v25 }
  0x85   : > { %3051 = vmatpush3.bf16.msra.mxu1 %v3048_v0  ;;  %3099 = vmatpush3.bf16.msra.mxu0 %v3797_v24 }
  0x87   : > { %2833 = vmatmul.mubr.f32.gmra.mrb[8].mxu1 %v3861_v28  ;;  %2953 = vmatmul.mubr.f32.gmra.mrb[8].mxu0 %v3861_v28 }
  0x88   : > { %2835 = vmatprep.mubr.f32.mxu1 %v3886_v60  ;;  %2955 = vmatprep.mubr.f32.mxu0 %v3886_v60 }
  0x8b   : > { %2836 = vmatmul.mubr.f32.gmra.mrb[10].mxu1 %v3913_v47  ;;  %2956 = vmatmul.mubr.f32.gmra.mrb[10].mxu0 %v3913_v47 }
  0x8c   : > { %2838 = vmatprep.mubr.f32.mxu1 %v3920_v34  ;;  %2958 = vmatprep.mubr.f32.mxu0 %v3920_v34 }
  0x8f   : > { %2839 = vmatmul.mubr.f32.gmra.mrb[12].mxu1 %v3939_v31  ;;  %2959 = vmatmul.mubr.f32.gmra.mrb[12].mxu0 %v3939_v31 }
  0x90   : > { %2841 = vmatprep.mubr.f32.mxu1 %v3961_v6  ;;  %2961 = vmatprep.mubr.f32.mxu0 %v3961_v6 }
  0x93   : > { %2842 = vmatmul.mubr.f32.gmra.mrb[14].mxu1 %v3963_v35  ;;  %2962 = vmatmul.mubr.f32.gmra.mrb[14].mxu0 %v3963_v35 }
  0x94   : > { %2860 = vmatprep.mubr.f32.mxu1 %v3720_v49  ;;  %2980 = vmatprep.mubr.f32.mxu0 %v3705_v41  ;;  %v4851_v41 = vld [vmem:[#allocation10_spill] sm:$0xff] }
  0x97   : > { %2861 = vmatmul.mubr.f32.vlgmr.msra.gmra.mrb[0].mxu1 %v3723_v50  ;;  %2981 = vmatmul.mubr.f32.vlgmr.msra.gmra.mrb[0].mxu0 %v3707_v42  ;;  %v1591_v42 = vlaneseq  ;;  %v1627_v50 = vstv %s3691_s5 }
  0x98   : > { %2863 = vmatprep.mubr.f32.mxu1 %v3771_v14  ;;  %2983 = vmatprep.mubr.f32.mxu0 %v3740_v63 }
  0x99   : > { %v1626_v49 = vand.u32 127, %v1591_v42  ;;  %v4067_v63 = vshrl.u32 %v1591_v42, 7 }
  0x9b   : > { %2864 = vmatmul.mubr.f32.gmra.mrb[2].mxu1 %v3779_v18  ;;  %2984 = vmatmul.mubr.f32.gmra.mrb[2].mxu0 %v3759_v11  ;;  %v4069_v4 = vadd.s32 %v1627_v50, %v1626_v49  ;;  %v1593_v11 = vadd.s32 8, %v4067_v63  ;;  %v1595_v14 = vadd.s32 24, %v4067_v63  ;;  %v1596_v36 = vadd.s32 32, %v4067_v63 }
  0x9c   : > { %2866 = vmatprep.mubr.f32.mxu1 %v3791_v23  ;;  %2986 = vmatprep.mubr.f32.mxu0 %v3773_v15  ;;  %v1594_v15 = vadd.s32 16, %v4067_v63  ;;  %v1597_v23 = vadd.s32 40, %v4067_v63  ;;  %v1600_v55 = vadd.s32 64, %v4067_v63  ;;  %v1603_v39 = vadd.s32 88, %v4067_v63 }
  0x9d   : > { %vm1645_vm3 = vcmp.lt.s32.totalorder %v4069_v4, 200  ;;  %v4100_v33 = vadd.s32 %v4073_v12, %v1595_v14  ;;  %v1602_v0 = vadd.s32 80, %v4067_v63  ;;  %v1605_v49 = vadd.s32 104, %v4067_v63 }
  0x9e   : > { %v4112_v20 = vadd.s32 %v4073_v12, %v1597_v23  ;;  %v4187_v37 = vadd.s32 %v4073_v12, %v1600_v55  ;;  %v4195_v10 = vadd.s32 %v4073_v12, %v1603_v39  ;;  %v1604_v50 = vadd.s32 96, %v4067_v63 }
  0x9f   : > { %2867 = vmatmul.mubr.f32.gmra.mrb[4].mxu1 %v3802_v27  ;;  %2987 = vmatmul.mubr.f32.gmra.mrb[4].mxu0 %v3781_v19  ;;  %4856 = vst [vmem:[#allocation14_spill] sm:$0xff] %v4100_v33  ;;  %vm1632_vm6 = vcmp.lt.s32.totalorder %v4100_v33, 200  ;;  %v1607_v55 = vadd.s32 120, %v4067_v63 }
  0xa0   : > { %2869 = vmatprep.mubr.f32.mxu1 %v3852_v13  ;;  %2989 = vmatprep.mubr.f32.mxu0 %v3837_v53  ;;  %v1599_v53 = vadd.s32 56, %v4067_v63  ;;  %4857 = vst [vmem:[#allocation15_spill] sm:$0xff] %v4112_v20  ;;  %vm1634_vm8 = vcmp.lt.s32.totalorder %v4112_v20, 200  ;;  %4866 = vst [vmem:[#allocation24_spill] sm:$0xff] %v4187_v37  ;;  %vm1637_vm13 = vcmp.lt.s32.totalorder %v4187_v37, 200  ;;  %vm1640_vm14 = vcmp.lt.s32.totalorder %v4195_v10, 200 }
  0xa1   : > { %4868 = vst [vmem:[#allocation26_spill] sm:$0xff] %v4195_v10 }
  0xa3   : > { %2870 = vmatmul.mubr.f32.gmra.mrb[6].mxu1 %v3857_v21  ;;  %2990 = vmatmul.mubr.f32.gmra.mrb[6].mxu0 %v3849_v2  ;;  %v4084_v2 = vadd.s32 %v4073_v12, %v1593_v11  ;;  %v1598_v21 = vadd.s32 48, %v4067_v63 }
  0xa4   : > { %2872 = vmatprep.mubr.f32.mxu1 %v3879_v48  ;;  %2992 = vmatprep.mubr.f32.mxu0 %v3859_v25  ;;  %v1601_v25 = vadd.s32 72, %v4067_v63 }
  0xa5   : > { %4853 = vst [vmem:[#allocation11_spill] sm:$0xff] %v4084_v2  ;;  %vm1630_vm4 = vcmp.lt.s32.totalorder %v4084_v2, 200  ;;  %v4126_v16 = vadd.s32 %v4073_v12, %v1598_v21 }
  0xa7   : > { %2873 = vmatmul.mubr.f32.gmra.mrb[8].mxu1 %v3882_v52  ;;  %2993 = vmatmul.mubr.f32.gmra.mrb[8].mxu0 %v3861_v28  ;;  %v4092_v28 = vadd.s32 %v4073_v12, %v4067_v63  ;;  %4862 = vst [vmem:[#allocation20_spill] sm:$0xff] %v4126_v16  ;;  %vm1635_vm11 = vcmp.lt.s32.totalorder %v4126_v16, 200 }
  0xa8   : > { %2875 = vmatprep.mubr.f32.mxu1 %v4851_v41  ;;  %2995 = vmatprep.mubr.f32.mxu0 %v3886_v60 }
  0xa9   : > { %4855 = vst [vmem:[#allocation13_spill] sm:$0xff] %v4092_v28  ;;  %vm1629_vm5 = vcmp.lt.s32.totalorder %v4092_v28, 200 }
  0xab   : > { %2876 = vmatmul.mubr.f32.gmra.mrb[10].mxu1 %v3925_v3  ;;  %2996 = vmatmul.mubr.f32.gmra.mrb[10].mxu0 %v3913_v47  ;;  %v4103_v47 = vadd.s32 %v4073_v12, %v1594_v15 }
  0xac   : > { %2878 = vmatprep.mubr.f32.mxu1 %v3937_v46  ;;  %2998 = vmatprep.mubr.f32.mxu0 %v3920_v34  ;;  %v4117_v46 = vadd.s32 %v4073_v12, %v1596_v36 }
  0xad   : > { %vm1631_vm7 = vcmp.lt.s32.totalorder %v4103_v47, 200 }
  0xae   : > { %4859 = vst [vmem:[#allocation17_spill] sm:$0xff] %v4117_v46  ;;  %vm1633_vm9 = vcmp.lt.s32.totalorder %v4117_v46, 200 }
  0xaf   : > { %2879 = vmatmul.mubr.f32.gmra.mrb[12].mxu1 %v3954_v62  ;;  %2999 = vmatmul.mubr.f32.gmra.mrb[12].mxu0 %v3939_v31  ;;  %v4120_v31 = vadd.s32 %v4073_v12, %v1599_v53  ;;  %v4129_v62 = vadd.s32 %v4073_v12, %v1601_v25 }
  0xb0   : > { %2881 = vmatprep.mubr.f32.mxu1 %v3967_v22  ;;  %3001 = vmatprep.mubr.f32.mxu0 %v3961_v6 }
  0xb1   : > { %4860 = vst [vmem:[#allocation18_spill] sm:$0xff] %v4120_v31  ;;  %4863 = vst [vmem:[#allocation21_spill] sm:$0xff] %v4129_v62  ;;  %vm1636_vm10 = vcmp.lt.s32.totalorder %v4120_v31, 200  ;;  %vm1638_vm12 = vcmp.lt.s32.totalorder %v4129_v62, 200 }
  0xb3   : > { %2882 = vmatmul.mubr.f32.gmra.mrb[14].mxu1 %v3974_v9  ;;  %3002 = vmatmul.mubr.f32.gmra.mrb[14].mxu0 %v3963_v35 }
 0x16a   : > { %v2862_v18 = vpop.f32.mrb[0].mxu1  ;;  %v2982_v19 = vpop.f32.mrb[0].mxu0 }
 0x16b   : > { %v4079_v24 = vadd.f32 %v2982_v19, %v2862_v18  ;;  %v926_v27 = vpop.f32.mrb[1].mxu1  ;;  %v1496_v32 = vpop.f32.mrb[1].mxu0 }
 0x16c   : > { %v4086_v13 = vadd.f32 %v1496_v32, %v926_v27 }
 0x16d   : > { %4852 = vst [vmem:[#allocation10_spill] sm:$0xff] %v4079_v24  ;;  %v4097_v30 = vsel %vm1645_vm3, %v4079_v24, -1e+30  ;;  %v4156_v61 = vsel %vm1630_vm4, %v4079_v24, -1e+30 }
 0x16e   : > { %4854 = vst [vmem:[#allocation12_spill] sm:$0xff] %v4086_v13  ;;  %v2985_v48 = vpop.f32.mrb[2].mxu0  ;;  %1730 = vmax.xlane.f32.xlu0 %v4097_v30  ;;  %v2865_v52 = vpop.f32.mrb[2].mxu1  ;;  %v4109_v60 = vsel %vm1645_vm3, %v4086_v13, -1e+30 }
 0x16f   : > { %v4114_v34 = vadd.f32 %v2985_v48, %v2865_v52  ;;  %v940_v3 = vpop.f32.mrb[3].mxu1  ;;  %v1508_v26 = vpop.f32.mrb[3].mxu0  ;;  %v4165_v5 = vsel %vm1629_vm5, %v4086_v13, -1e+30  ;;  %v4242_v48 = vadd.s32 %v4073_v12, %v1602_v0  ;;  %vm2171_vm5 = vcmp.eq.s32.totalorder (!%p2165_p2), %v4103_v47, %v4069_v4  ;;  %v4904_v47 = vld [vmem:[#allocation15_spill] sm:$0xff] (!%p2165_p2) }
 0x170   : > { %v4123_v1 = vadd.f32 %v1508_v26, %v940_v3  ;;  %v4248_v3 = vadd.s32 %v4073_v12, %v1605_v49  ;;  %v1606_v49 = vadd.s32 112, %v4067_v63 }
 0x171   : > { %4858 = vst [vmem:[#allocation16_spill] sm:$0xff] %v4114_v34  ;;  %v4137_v45 = vsel %vm1645_vm3, %v4114_v34, -1e+30  ;;  %v4201_v41 = vsel %vm1632_vm6, %v4114_v34, -1e+30  ;;  %4871 = vst [vmem:[#allocation29_spill] sm:$0xff] %v4242_v48 }
 0x172   : > { %4861 = vst [vmem:[#allocation19_spill] sm:$0xff] %v4123_v1  ;;  %v2988_v6 = vpop.f32.mrb[4].mxu0  ;;  %1728 = vmax.xlane.f32.xlu0 %v4109_v60  ;;  %1734 = vmax.xlane.f32.xlu1 %v4137_v45  ;;  %v2868_v35 = vpop.f32.mrb[4].mxu1  ;;  %v4145_v22 = vsel %vm1645_vm3, %v4123_v1, -1e+30  ;;  %4873 = vst [vmem:[#allocation31_spill] sm:$0xff] %v4248_v3 }
 0x173   : > { %v4148_v17 = vadd.f32 %v2988_v6, %v2868_v35  ;;  %v954_v9 = vpop.f32.mrb[5].mxu1  ;;  %v1520_v51 = vpop.f32.mrb[5].mxu0  ;;  %v4210_v11 = vsel %vm1631_vm7, %v4123_v1, -1e+30  ;;  %v4261_v35 = vadd.s32 %v4073_v12, %v1604_v50  ;;  %vm1639_vm15 = vcmp.lt.s32.totalorder %v4242_v48, 200 }
 0x174   : > { %v4158_v54 = vadd.f32 %v1520_v51, %v954_v9  ;;  %vm1642_vm0 = vcmp.lt.s32.totalorder %v4248_v3, 200 }
 0x175   : > { %4864 = vst [vmem:[#allocation22_spill] sm:$0xff] %v4148_v17  ;;  %v4168_v8 = vsel %vm1634_vm8, %v4148_v17, -1e+30  ;;  %v4173_v29 = vsel %vm1645_vm3, %v4148_v17, -1e+30  ;;  %4874 = vst [vmem:[#allocation32_spill] sm:$0xff] %v4261_v35 }
 0x176   : > { %4865 = vst [vmem:[#allocation23_spill] sm:$0xff] %v4158_v54  ;;  %v2066_v40 = vmax.f32 %v4156_v61, %v4168_v8  ;;  %v4178_v38 = vsel %vm1633_vm9, %v4158_v54, -1e+30  ;;  %v2991_v58 = vpop.f32.mrb[6].mxu0  ;;  %1732 = vmax.xlane.f32.xlu1 %v4145_v22  ;;  %v2871_v56 = vpop.f32.mrb[6].mxu1  ;;  %vm1641_vm1 = vcmp.lt.s32.totalorder %v4261_v35, 200  ;;  %vm2174_vm9 = vcmp.eq.s32.totalorder (!%p2165_p2), %v4904_v47, %v4069_v4 }
 0x177   : > { %v4184_v43 = vsel %vm1645_vm3, %v4158_v54, -1e+30  ;;  %v2065_v44 = vmax.f32 %v4165_v5, %v4178_v38  ;;  %v4191_v57 = vadd.f32 %v2991_v58, %v2871_v56  ;;  %v1532_v59 = vpop.f32.mrb[7].mxu0  ;;  %v968_v7 = vpop.f32.mrb[7].mxu1  ;;  %v4542_v54 = vld [vmem:[#allocation3 + $0x78] sm:$0xff]  ;;  %v2222_v47 = vld [vmem:[#allocation5 + $0x28] sm:$0xff] (!%p2165_p2) }
 0x178   : > { %1736 = vmax.xlane.f32.xlu0 %v4184_v43  ;;  %v4203_v42 = vadd.f32 %v1532_v59, %v968_v7 }
 0x179   : > { %4867 = vst [vmem:[#allocation25_spill] sm:$0xff] %v4191_v57  ;;  %v4215_v14 = vsel %vm1636_vm10, %v4191_v57, -1e+30  ;;  %v4220_v15 = vsel %vm1645_vm3, %v4191_v57, -1e+30 }
 0x17a   : > { %4869 = vst [vmem:[#allocation27_spill] sm:$0xff] %v4203_v42  ;;  %v2068_v18 = vmax.f32 %v4201_v41, %v4215_v14  ;;  %v4227_v19 = vsel %vm1635_vm11, %v4203_v42, -1e+30  ;;  %v2994_v23 = vpop.f32.mrb[8].mxu0  ;;  %1738 = vmax.xlane.f32.xlu1 %v4173_v29  ;;  %v2874_v27 = vpop.f32.mrb[8].mxu1 }
 0x17b   : > { %v4233_v32 = vsel %vm1645_vm3, %v4203_v42, -1e+30  ;;  %v2067_v36 = vmax.f32 %v4210_v11, %v4227_v19  ;;  %v4237_v53 = vadd.f32 %v2994_v23, %v2874_v27  ;;  %v1544_v21 = vpop.f32.mrb[9].mxu0  ;;  %v982_v25 = vpop.f32.mrb[9].mxu1  ;;  %v4295_v27 = vadd.s32 %v4073_v12, %v1607_v55 }
 0x17c   : > { %1740 = vmax.xlane.f32.xlu0 %v4233_v32  ;;  %v4244_v52 = vadd.f32 %v1544_v21, %v982_v25 }
 0x17d   : > { %4870 = vst [vmem:[#allocation28_spill] sm:$0xff] %v4237_v53  ;;  %v4253_v26 = vsel %vm1638_vm12, %v4237_v53, -1e+30  ;;  %v4258_v6 = vsel %vm1645_vm3, %v4237_v53, -1e+30  ;;  %4877 = vst [vmem:[#allocation35_spill] sm:$0xff] %v4295_v27 }
 0x17e   : > { %4872 = vst [vmem:[#allocation30_spill] sm:$0xff] %v4244_v52  ;;  %v2070_v9 = vmax.f32 %v2066_v40, %v4253_v26  ;;  %v4266_v51 = vsel %vm1637_vm13, %v4244_v52, -1e+30  ;;  %v2997_v39 = vpop.f32.mrb[10].mxu0  ;;  %1742 = vmax.xlane.f32.xlu1 %v4220_v15  ;;  %v2877_v58 = vpop.f32.mrb[10].mxu1  ;;  %v3485_v53 = vmov 0  }
 0x17f   : > { %v4272_v56 = vsel %vm1645_vm3, %v4244_v52, -1e+30  ;;  %v2069_v59 = vmax.f32 %v2065_v44, %v4266_v51  ;;  %v4275_v7 = vadd.f32 %v2997_v39, %v2877_v58  ;;  %v1556_v0 = vpop.f32.mrb[11].mxu0  ;;  %v996_v40 = vpop.f32.mrb[11].mxu1  ;;  %3255 = vset.pattern.permute.xlu1 %v3485_v53  ;;  %3256 = vset.pattern.permute.xlu0 %v3485_v53  ;;  %vm1644_vm2 = vcmp.lt.s32.totalorder %v4295_v27, 200 }
 0x180   : > { %1744 = vmax.xlane.f32.xlu0 %v4272_v56  ;;  %v4280_v50 = vadd.f32 %v1556_v0, %v996_v40 }
 0x181   : > { %4875 = vst [vmem:[#allocation33_spill] sm:$0xff] %v4275_v7  ;;  %v4286_v23 = vsel %vm1640_vm14, %v4275_v7, -1e+30  ;;  %v4292_v44 = vsel %vm1645_vm3, %v4275_v7, -1e+30  ;;  %v4312_v7 = vadd.s32 %v4073_v12, %v1606_v49 }
 0x182   : > { %4876 = vst [vmem:[#allocation34_spill] sm:$0xff] %v4280_v50  ;;  %v2072_v63 = vmax.f32 %v2068_v18, %v4286_v23  ;;  %v4299_v21 = vsel %vm1639_vm15, %v4280_v50, -1e+30  ;;  %v3000_v25 = vpop.f32.mrb[12].mxu0  ;;  %1746 = vmax.xlane.f32.xlu1 %v4258_v6  ;;  %v2880_v39 = vpop.f32.mrb[12].mxu1 }
 0x183   : > { %v4305_v58 = vsel %vm1645_vm3, %v4280_v50, -1e+30  ;;  %v2071_v0 = vmax.f32 %v2067_v36, %v4299_v21  ;;  %v4308_v40 = vadd.f32 %v3000_v25, %v2880_v39  ;;  %v1568_v55 = vpop.f32.mrb[13].mxu0  ;;  %v1010_v18 = vpop.f32.mrb[13].mxu1  ;;  %4879 = vst [vmem:[#allocation37_spill] sm:$0xff] %v4312_v7  ;;  %vm1643_vm4 = vcmp.lt.s32.totalorder %v4312_v7, 200 }
 0x184   : > { %1748 = vmax.xlane.f32.xlu0 %v4305_v58  ;;  %v4314_v52 = vadd.f32 %v1568_v55, %v1010_v18 }
 0x185   : > { %4878 = vst [vmem:[#allocation36_spill] sm:$0xff] %v4308_v40  ;;  %v4319_v50 = vsel %vm1642_vm0, %v4308_v40, -1e+30  ;;  %v4325_v36 = vsel %vm1645_vm3, %v4308_v40, -1e+30 }
 0x186   : > { %4880 = vst [vmem:[#allocation38_spill] sm:$0xff] %v4314_v52  ;;  %v2074_v12 = vmax.f32 %v2070_v9, %v4319_v50  ;;  %v4331_v49 = vsel %vm1641_vm1, %v4314_v52, -1e+30  ;;  %v3003_v53 = vpop.f32.mrb[14].mxu0  ;;  %1750 = vmax.xlane.f32.xlu1 %v4292_v44  ;;  %v2883_v25 = vpop.f32.mrb[14].mxu1 }
 0x187   : > { %v4337_v39 = vsel %vm1645_vm3, %v4314_v52, -1e+30  ;;  %v2073_v55 = vmax.f32 %v2069_v59, %v4331_v49  ;;  %v4340_v18 = vadd.f32 %v3003_v53, %v2883_v25  ;;  %v1580_v40 = vpop.f32.mrb[15].mxu0  ;;  %v1024_v9 = vpop.f32.mrb[15].mxu1 }
 0x188   : > { %1752 = vmax.xlane.f32.xlu0 %v4337_v39  ;;  %v4344_v35 = vadd.f32 %v1580_v40, %v1024_v9 }
 0x189   : > { %4881 = vst [vmem:[#allocation39_spill] sm:$0xff] %v4340_v18  ;;  %v2077_v3 = vmax.f32 %v2073_v55, %v2074_v12  ;;  %v4349_v48 = vsel %vm1644_vm2, %v4340_v18, -1e+30  ;;  %v4354_v59 = vsel %vm1645_vm3, %v4340_v18, -1e+30 }
 0x18a   : > { %4882 = vst [vmem:[#allocation40_spill] sm:$0xff] %v4344_v35  ;;  %v2076_v53 = vmax.f32 %v2072_v63, %v4349_v48  ;;  %v4358_v25 = vsel %vm1643_vm4, %v4344_v35, -1e+30  ;;  %1754 = vmax.xlane.f32.xlu1 %v4325_v36  ;;  %v4364_v40 = vsel %vm1645_vm3, %v4344_v35, -1e+30  ;;  %vm2032_vm3 = vcmask 7168  }
 0x18b   : > { %v2075_v12 = vmax.f32 %v2071_v0, %v4358_v25 }
 0x18c   : > { %1756 = vmax.xlane.f32.xlu0 %v4364_v40 }
 0x18d   : > { %v2078_v55 = vmax.f32 %v2075_v12, %v2076_v53 }
 0x18e   : > { %1758 = vmax.xlane.f32.xlu1 %v4354_v59 }
 0x18f   : > { %v2079_v9 = vmax.f32 %v2077_v3, %v2078_v55 }
 0x191   : > { %v2080_v18 = vrot.slane %v2079_v9, 4 }
 0x193   : > { %v2081_v63 = vmax.f32 %v2079_v9, %v2080_v18 }
 0x195   : > { %v2082_v52 = vrot.slane %v2081_v63, 2 }
 0x197   : > { %v2083_v7 = vmax.f32 %v2081_v63, %v2082_v52 }
 0x199   : > { %v2084_v27 = vrot.slane %v2083_v7, 1 }
 0x19b   : > { %v4369_v10 = vmax.f32 %v2083_v7, %v2084_v27 }
 0x19d   : > { %v2086_v42 = vsub.f32 %v4165_v5, %v4369_v10  ;;  %v2087_v35 = vsub.f32 %v4156_v61, %v4369_v10  ;;  %v2088_v0 = vsub.f32 %v4210_v11, %v4369_v10  ;;  %v2089_v53 = vsub.f32 %v4201_v41, %v4369_v10 }
 0x19e   : > { %v2090_v52 = vsub.f32 %v4178_v38, %v4369_v10  ;;  %v2091_v7 = vsub.f32 %v4168_v8, %v4369_v10  ;;  %v2092_v61 = vsub.f32 %v4227_v19, %v4369_v10  ;;  %v2093_v41 = vsub.f32 %v4215_v14, %v4369_v10 }
 0x19f   : > { %v2102_v3 = vmul.f32 1.442695, %v2086_v42  ;;  %v2104_v12 = vmul.f32 1.442695, %v2087_v35  ;;  %v2106_v18 = vmul.f32 1.442695, %v2088_v0  ;;  %v2094_v38 = vsub.f32 %v4266_v51, %v4369_v10 }
 0x1a0   : > { %v2108_v5 = vmul.f32 1.442695, %v2089_v53  ;;  %v2110_v11 = vmul.f32 1.442695, %v2090_v52  ;;  %v2112_v42 = vmul.f32 1.442695, %v2091_v7  ;;  %v2095_v8 = vsub.f32 %v4253_v26, %v4369_v10 }
 0x1a1   : > { %3257 = vpow2.f32 %v2102_v3  ;;  %v2114_v35 = vmul.f32 1.442695, %v2092_v61  ;;  %v2116_v27 = vmul.f32 1.442695, %v2093_v41  ;;  %v2096_v19 = vsub.f32 %v4299_v21, %v4369_v10 }
 0x1a2   : > { %3259 = vpow2.f32 %v2104_v12  ;;  %v2118_v63 = vmul.f32 1.442695, %v2094_v38  ;;  %v2097_v53 = vsub.f32 %v4286_v23, %v4369_v10  ;;  %v2120_v51 = vmul.f32 1.442695, %v2095_v8 }
 0x1a3   : > { %3261 = vpow2.f32 %v2106_v18  ;;  %v2098_v26 = vsub.f32 %v4331_v49, %v4369_v10  ;;  %v2122_v52 = vmul.f32 1.442695, %v2096_v19  ;;  %v2099_v21 = vsub.f32 %v4319_v50, %v4369_v10 }
 0x1a4   : > { %3263 = vpow2.f32 %v2108_v5  ;;  %v2124_v5 = vmul.f32 1.442695, %v2097_v53  ;;  %v2100_v23 = vsub.f32 %v4358_v25, %v4369_v10  ;;  %v2101_v49 = vsub.f32 %v4349_v48, %v4369_v10 }
 0x1a5   : > { %3265 = vpow2.f32 %v2110_v11  ;;  %v2126_v41 = vmul.f32 1.442695, %v2098_v26 }
 0x1a6   : > { %3267 = vpow2.f32 %v2112_v42  ;;  %v2130_v50 = vmul.f32 1.442695, %v2100_v23  ;;  %v2132_v19 = vmul.f32 1.442695, %v2101_v49 }
 0x1a7   : > { %3269 = vpow2.f32 %v2114_v35  ;;  %v2128_v35 = vmul.f32 1.442695, %v2099_v21 }
 0x1a8   : > { %3271 = vpow2.f32 %v2116_v27 }
 0x1a9   : > { %3273 = vpow2.f32 %v2118_v63 }
 0x1aa   : > { %3275 = vpow2.f32 %v2120_v51 }
 0x1ab   : > { %v3258_v55 = vpop.eup %3257  ;;  %3277 = vpow2.f32 %v2122_v52 }
 0x1ac   : > { %v3260_v9 = vpop.eup %3259  ;;  %3279 = vpow2.f32 %v2124_v5 }
 0x1ad   : > { %v2134_v14 = vadd.f32 %v3260_v9, %v3258_v55  ;;  %v3262_v0 = vpop.eup %3261  ;;  %3281 = vpow2.f32 %v2126_v41 }
 0x1ae   : > { %v3264_v12 = vpop.eup %3263  ;;  %3283 = vpow2.f32 %v2128_v35 }
 0x1af   : > { %v2135_v3 = vadd.f32 %v3262_v0, %v2134_v14  ;;  %v3266_v7 = vpop.eup %3265  ;;  %3285 = vpow2.f32 %v2130_v50 }
 0x1b0   : > { %v3268_v11 = vpop.eup %3267  ;;  %3287 = vpow2.f32 %v2132_v19  ;;  %v4412_v19 = vld [vmem:[#allocation3 + $0x18] sm:$0xff] }
 0x1b1   : > { %v2136_v18 = vadd.f32 %v3264_v12, %v2135_v3  ;;  %v3270_v38 = vpop.eup %3269 }
 0x1b2   : > { %v3272_v27 = vpop.eup %3271 }
 0x1b3   : > { %v2137_v61 = vadd.f32 %v3266_v7, %v2136_v18  ;;  %v3274_v9 = vpop.eup %3273 }
 0x1b4   : > { %v3276_v14 = vpop.eup %3275 }
 0x1b5   : > { %v2138_v42 = vadd.f32 %v3268_v11, %v2137_v61  ;;  %v3278_v0 = vpop.eup %3277 }
 0x1b6   : > { %v3280_v51 = vpop.eup %3279 }
 0x1b7   : > { %v2139_v8 = vadd.f32 %v3270_v38, %v2138_v42  ;;  %v3282_v48 = vpop.eup %3281 }
 0x1b8   : > { %v3284_v26 = vpop.eup %3283 }
 0x1b9   : > { %v2140_v55 = vadd.f32 %v3272_v27, %v2139_v8  ;;  %v3286_v18 = vpop.eup %3285  ;;  %v4405_v27 = vld [vmem:[#allocation3 + $0x8] sm:$0xff] }
 0x1ba   : > { %v3288_v21 = vpop.eup %3287 }
 0x1bb   : > { %v2141_v63 = vadd.f32 %v3274_v9, %v2140_v55  ;;  %v4410_v9 = vld [vmem:[#allocation3] sm:$0xff] }
 0x1bd   : > { %v2142_v25 = vadd.f32 %v3276_v14, %v2141_v63  ;;  %v4522_v63 = vld [vmem:[#allocation3 + $0x68] sm:$0xff] }
 0x1bf   : > { %v2143_v53 = vadd.f32 %v3278_v0, %v2142_v25 }
 0x1c1   : > { %v2144_v3 = vadd.f32 %v3280_v51, %v2143_v53  ;;  %v4425_v53 = vld [vmem:[#allocation3 + $0x10] sm:$0xff] }
 0x1c3   : > { %v2145_v12 = vadd.f32 %v3282_v48, %v2144_v3  ;;  %v4437_v48 = vld [vmem:[#allocation3 + $0x20] sm:$0xff] }
 0x1c5   : > { %v2146_v52 = vadd.f32 %v3284_v26, %v2145_v12 }
 0x1c7   : > { %v2147_v7 = vadd.f32 %v3286_v18, %v2146_v52 }
 0x1c9   : > { %v2148_v5 = vadd.f32 %v3288_v21, %v2147_v7  ;;  %v4445_v7 = vld [vmem:[#allocation3 + $0x28] sm:$0xff] }
 0x1cb   : > { %v2149_v61 = vrot.slane %v2148_v5, 4 }
 0x1cd   : > { %v2150_v11 = vadd.f32 %v2149_v61, %v2148_v5  ;;  %v4452_v5 = vld [vmem:[#allocation3 + $0x30] sm:$0xff] }
 0x1cf   : > { %v2151_v23 = vrot.slane %v2150_v11, 2 }
 0x1d1   : > { %v2152_v41 = vadd.f32 %v2151_v23, %v2150_v11 }
 0x1d3   : > { %v2153_v42 = vrot.slane %v2152_v41, 1 }
 0x1d5   : > { %v2154_v38 = vadd.f32 %v2153_v42, %v2152_v41 }
 0x1d7   : > { %3289 = vlog2.f32 %v2154_v38  ;;  %v4464_v38 = vld [vmem:[#allocation3 + $0x38] sm:$0xff] }
 0x1e1   : > { %v3290_v49 = vpop.eup %3289 }
 0x1e2   : > { %v2156_v35 = vmul.f32 0.6931472, %v3290_v49  ;;  %v4502_v49 = vld [vmem:[#allocation3 + $0x58] sm:$0xff] }
 0x1e4   : > { %v2157_v8 = vadd.f32 %v2156_v35, %v4369_v10  ;;  %v4471_v35 = vld [vmem:[#allocation3 + $0x40] sm:$0xff] }
 0x1e6   : > { %2158 = vst [vmem:[%s3601_s25] sm:$0x1] %v2157_v8 }
 0x1fb   : > { %v1731_v50 = vpop.xlane.xlu0 %1730 }
 0x1fc   : > { %v4408_v55 = vmax.f32 %v4405_v27, %v1731_v50 }
 0x1fe   : > { %2050 = vst.msk [vmem:[#allocation3 + $0x8] sm:$0xff] %vm2032_vm3, %v4408_v55  ;;  %1863 = vperm.xlu1 %3255, %v4408_v55  }
 0x1ff   : > { %v1729_v10 = vpop.xlane.xlu0 %1728  ;;  %v1735_v14 = vpop.xlane.xlu1 %1734 }
 0x200   : > { %v4420_v25 = vmax.f32 %v4410_v9, %v1729_v10  ;;  %v4423_v0 = vmax.f32 %v4412_v19, %v1735_v14 }
 0x202   : > { %2049 = vst.msk [vmem:[#allocation3] sm:$0xff] %vm2032_vm3, %v4420_v25  ;;  %2052 = vst.msk [vmem:[#allocation3 + $0x18] sm:$0xff] %vm2032_vm3, %v4423_v0  ;;  %1873 = vperm.xlu1 %3255, %v4423_v0   ;;  %1858 = vperm.xlu0 %3256, %v4420_v25  }
 0x203   : > { %v1733_v12 = vpop.xlane.xlu1 %1732 }
 0x204   : > { %v4440_v26 = vmax.f32 %v4425_v53, %v1733_v12 }
 0x205   : > { %v1737_v52 = vpop.xlane.xlu0 %1736 }
 0x206   : > { %v4443_v18 = vmax.f32 %v4437_v48, %v1737_v52  ;;  %2051 = vst.msk [vmem:[#allocation3 + $0x10] sm:$0xff] %vm2032_vm3, %v4440_v26  ;;  %1868 = vperm.xlu1 %3255, %v4440_v26   ;;  %v4483_v52 = vld [vmem:[#allocation3 + $0x48] sm:$0xff] }
 0x207   : > { %v1739_v11 = vpop.xlane.xlu1 %1738 }
 0x208   : > { %2053 = vst.msk [vmem:[#allocation3 + $0x20] sm:$0xff] %vm2032_vm3, %v4443_v18  ;;  %v4459_v23 = vmax.f32 %v4445_v7, %v1739_v11 }
 0x209   : > { %v1741_v41 = vpop.xlane.xlu0 %1740 }
 0x20a   : > { %v4462_v42 = vmax.f32 %v4452_v5, %v1741_v41  ;;  %2054 = vst.msk [vmem:[#allocation3 + $0x28] sm:$0xff] %vm2032_vm3, %v4459_v23  ;;  %1883 = vperm.xlu1 %3255, %v4459_v23   ;;  %v4490_v41 = vld [vmem:[#allocation3 + $0x50] sm:$0xff] }
 0x20b   : > { %v1743_v50 = vpop.xlane.xlu1 %1742 }
 0x20c   : > { %2055 = vst.msk [vmem:[#allocation3 + $0x30] sm:$0xff] %vm2032_vm3, %v4462_v42  ;;  %v4478_v10 = vmax.f32 %v4464_v38, %v1743_v50  ;;  %v4510_v50 = vld [vmem:[#allocation3 + $0x60] sm:$0xff] }
 0x20d   : > { %v1745_v14 = vpop.xlane.xlu0 %1744 }
 0x20e   : > { %v4481_v12 = vmax.f32 %v4471_v35, %v1745_v14  ;;  %2056 = vst.msk [vmem:[#allocation3 + $0x38] sm:$0xff] %vm2032_vm3, %v4478_v10  ;;  %1878 = vperm.xlu1 %3255, %v4443_v18  }
 0x20f   : > { %v1747_v14 = vpop.xlane.xlu1 %1746 }
 0x210   : > { %2057 = vst.msk [vmem:[#allocation3 + $0x40] sm:$0xff] %vm2032_vm3, %v4481_v12  ;;  %v4497_v8 = vmax.f32 %v4483_v52, %v1747_v14  ;;  %v4530_v14 = vld [vmem:[#allocation3 + $0x70] sm:$0xff] }
 0x211   : > { %v1749_v61 = vpop.xlane.xlu0 %1748 }
 0x212   : > { %v4500_v11 = vmax.f32 %v4490_v41, %v1749_v61  ;;  %2058 = vst.msk [vmem:[#allocation3 + $0x48] sm:$0xff] %vm2032_vm3, %v4497_v8  ;;  %1893 = vperm.xlu1 %3255, %v4478_v10   ;;  %1903 = vperm.xlu0 %3256, %v4497_v8  }
 0x213   : > { %v1751_v61 = vpop.xlane.xlu1 %1750 }
 0x214   : > { %2059 = vst.msk [vmem:[#allocation3 + $0x50] sm:$0xff] %vm2032_vm3, %v4500_v11  ;;  %v4517_v21 = vmax.f32 %v4502_v49, %v1751_v61 }
 0x215   : > { %v1753_v3 = vpop.xlane.xlu0 %1752 }
 0x216   : > { %v4520_v51 = vmax.f32 %v4510_v50, %v1753_v3  ;;  %2060 = vst.msk [vmem:[#allocation3 + $0x58] sm:$0xff] %vm2032_vm3, %v4517_v21  ;;  %1888 = vperm.xlu1 %3255, %v4462_v42   ;;  %1913 = vperm.xlu0 %3256, %v4517_v21  }
 0x217   : > { %v1755_v3 = vpop.xlane.xlu1 %1754 }
 0x218   : > { %2061 = vst.msk [vmem:[#allocation3 + $0x60] sm:$0xff] %vm2032_vm3, %v4520_v51  ;;  %v4537_v37 = vmax.f32 %v4522_v63, %v1755_v3 }
 0x219   : > { %v1757_v57 = vpop.xlane.xlu0 %1756 }
 0x21a   : > { %v4540_v62 = vmax.f32 %v4530_v14, %v1757_v57  ;;  %2062 = vst.msk [vmem:[#allocation3 + $0x68] sm:$0xff] %vm2032_vm3, %v4537_v37  ;;  %1898 = vperm.xlu1 %3255, %v4481_v12   ;;  %1923 = vperm.xlu0 %3256, %v4537_v37  }
 0x21b   : > { %v1759_v57 = vpop.xlane.xlu1 %1758 }
 0x21c   : > { %2063 = vst.msk [vmem:[#allocation3 + $0x70] sm:$0xff] %vm2032_vm3, %v4540_v62  ;;  %v4555_v61 = vmax.f32 %v4542_v54, %v1759_v57 }
 0x21e   : > { %2064 = vst.msk [vmem:[#allocation3 + $0x78] sm:$0xff] %vm2032_vm3, %v4555_v61  ;;  %1908 = vperm.xlu1 %3255, %v4500_v11   ;;  %1933 = vperm.xlu0 %3256, %v4555_v61  }
 0x222   : > { %1918 = vperm.xlu1 %3255, %v4520_v51  }
 0x226   : > { %1928 = vperm.xlu1 %3255, %v4540_v62  }
 0x27d   : > { %v1864_v3 = vpop.permute.xlu1 %1863 }
 0x27e   : > { %v1937_v16 = vsub.f32 %v4097_v30, %v1864_v3 }
 0x280   : > { %v1954_v31 = vmul.f32 1.442695, %v1937_v16 }
 0x281   : > { %v1874_v57 = vpop.permute.xlu1 %1873  ;;  %v1859_v24 = vpop.permute.xlu0 %1858 }
 0x282   : > { %3291 = vpow2.f32 %v1954_v31  ;;  %v1936_v17 = vsub.f32 %v4109_v60, %v1859_v24  ;;  %v1939_v34 = vsub.f32 %v4137_v45, %v1874_v57 }
 0x284   : > { %v1952_v46 = vmul.f32 1.442695, %v1936_v17  ;;  %v1958_v1 = vmul.f32 1.442695, %v1939_v34 }
 0x285   : > { %v1869_v20 = vpop.permute.xlu1 %1868 }
 0x286   : > { %v1938_v13 = vsub.f32 %v4145_v22, %v1869_v20  ;;  %3293 = vpow2.f32 %v1952_v46 }
 0x288   : > { %v1956_v2 = vmul.f32 1.442695, %v1938_v13 }
 0x289   : > { %v1884_v33 = vpop.permute.xlu1 %1883 }
 0x28a   : > { %3295 = vpow2.f32 %v1956_v2  ;;  %v1941_v28 = vsub.f32 %v4173_v29, %v1884_v33 }
 0x28b   : > { %3297 = vpow2.f32 %v1958_v1 }
 0x28c   : > { %v3292_v30 = vpop.eup %3291  ;;  %v1962_v16 = vmul.f32 1.442695, %v1941_v28 }
 0x28d   : > { %v1879_v3 = vpop.permute.xlu1 %1878  ;;  %1986 = vadd.xlane.f32.xlu0 %v3292_v30 }
 0x28e   : > { %3299 = vpow2.f32 %v1962_v16  ;;  %v1940_v24 = vsub.f32 %v4184_v43, %v1879_v3 }
 0x290   : > { %v1960_v60 = vmul.f32 1.442695, %v1940_v24  ;;  %v3294_v31 = vpop.eup %3293 }
 0x291   : > { %v1894_v45 = vpop.permute.xlu1 %1893  ;;  %v1904_v17 = vpop.permute.xlu0 %1903  ;;  %1984 = vadd.xlane.f32.xlu1 %v3294_v31 }
 0x292   : > { %3301 = vpow2.f32 %v1960_v60  ;;  %v1943_v20 = vsub.f32 %v4220_v15, %v1894_v45  ;;  %v1945_v2 = vsub.f32 %v4258_v6, %v1904_v17 }
 0x294   : > { %v3296_v13 = vpop.eup %3295  ;;  %v1966_v33 = vmul.f32 1.442695, %v1943_v20  ;;  %v1970_v46 = vmul.f32 1.442695, %v1945_v2 }
 0x295   : > { %v3298_v34 = vpop.eup %3297  ;;  %v1889_v28 = vpop.permute.xlu1 %1888  ;;  %1988 = vadd.xlane.f32.xlu0 %v3296_v13 }
 0x296   : > { %v1914_v1 = vpop.permute.xlu0 %1913  ;;  %3303 = vpow2.f32 %v1966_v33  ;;  %v1942_v22 = vsub.f32 %v4233_v32, %v1889_v28  ;;  %1990 = vadd.xlane.f32.xlu1 %v3298_v34 }
 0x297   : > { %v1947_v29 = vsub.f32 %v4292_v44, %v1914_v1  ;;  %3305 = vpow2.f32 %v1970_v46 }
 0x298   : > { %v3300_v43 = vpop.eup %3299  ;;  %v1964_v57 = vmul.f32 1.442695, %v1942_v22 }
 0x299   : > { %v1974_v15 = vmul.f32 1.442695, %v1947_v29  ;;  %v1899_v30 = vpop.permute.xlu1 %1898 }
 0x29a   : > { %v1924_v16 = vpop.permute.xlu0 %1923  ;;  %3307 = vpow2.f32 %v1964_v57  ;;  %v1944_v6 = vsub.f32 %v4272_v56, %v1899_v30  ;;  %1994 = vadd.xlane.f32.xlu1 %v3300_v43  ;;  %v4883_v30 = vsub.f32 %v4405_v27, %v4408_v55  ;;  %v4887_v27 = vsub.f32 %v4445_v7, %v4459_v23 }
 0x29b   : > { %v1949_v3 = vsub.f32 %v4325_v36, %v1924_v16  ;;  %3309 = vpow2.f32 %v1974_v15  ;;  %v4884_v16 = vsub.f32 %v4410_v9, %v4420_v25  ;;  %v4888_v9 = vsub.f32 %v4437_v48, %v4443_v18 }
 0x29c   : > { %v3302_v24 = vpop.eup %3301  ;;  %v1968_v60 = vmul.f32 1.442695, %v1944_v6  ;;  %v1818_v55 = vmul.f32 1.442695, %v4887_v27  ;;  %v4890_v48 = vsub.f32 %v4452_v5, %v4462_v42 }
 0x29d   : > { %v1978_v31 = vmul.f32 1.442695, %v1949_v3  ;;  %v1909_v32 = vpop.permute.xlu1 %1908  ;;  %1992 = vadd.xlane.f32.xlu0 %v3302_v24  ;;  %v1808_v6 = vmul.f32 1.442695, %v4884_v16  ;;  %v4885_v3 = vsub.f32 %v4425_v53, %v4440_v26  ;;  %v1816_v25 = vmul.f32 1.442695, %v4888_v9 }
 0x29e   : > { %v1934_v45 = vpop.permute.xlu0 %1933  ;;  %3311 = vpow2.f32 %v1968_v60  ;;  %v1946_v44 = vsub.f32 %v4305_v58, %v1909_v32  ;;  %v4886_v60 = vsub.f32 %v4412_v19, %v4423_v0  ;;  %v4889_v19 = vsub.f32 %v4464_v38, %v4478_v10 }
 0x29f   : > { %v1951_v17 = vsub.f32 %v4354_v59, %v1934_v45  ;;  %3313 = vpow2.f32 %v1978_v31  ;;  %v1812_v24 = vmul.f32 1.442695, %v4885_v3  ;;  %v1777_v45 = vld [vmem:[#allocation4 + $0x8] sm:$0xff]  ;;  %v1820_v18 = vmul.f32 1.442695, %v4890_v48  ;;  %v1783_v3 = vld [vmem:[#allocation4 + $0x38] sm:$0xff] }
 0x2a0   : > { %v3304_v20 = vpop.eup %3303  ;;  %v1972_v2 = vmul.f32 1.442695, %v1946_v44  ;;  %v1814_v31 = vmul.f32 1.442695, %v4886_v60  ;;  %v1822_v0 = vmul.f32 1.442695, %v4889_v19 }
 0x2a1   : > { %v1982_v13 = vmul.f32 1.442695, %v1951_v17  ;;  %v1919_v56 = vpop.permute.xlu1 %1918  ;;  %1998 = vadd.xlane.f32.xlu1 %v3304_v20  ;;  %v3306_v33 = vpop.eup %3305  ;;  %v1776_v20 = vld [vmem:[#allocation4] sm:$0xff]  ;;  %v1789_v48 = vld [vmem:[#allocation4 + $0x68] sm:$0xff] }
 0x2a2   : > { %3315 = vpow2.f32 %v1972_v2  ;;  %v1948_v36 = vsub.f32 %v4337_v39, %v1919_v56  ;;  %v1778_v2 = vld [vmem:[#allocation4 + $0x10] sm:$0xff] }
 0x2a3   : > { %3317 = vpow2.f32 %v1982_v13 }
 0x2a4   : > { %v3308_v34 = vpop.eup %3307  ;;  %v1976_v46 = vmul.f32 1.442695, %v1948_v36  ;;  %v1779_v36 = vld [vmem:[#allocation4 + $0x18] sm:$0xff] }
 0x2a5   : > { %1996 = vadd.xlane.f32.xlu0 %v3308_v34  ;;  %v1929_v28 = vpop.permute.xlu1 %1928  ;;  %2002 = vadd.xlane.f32.xlu1 %v3306_v33  ;;  %v3310_v59 = vpop.eup %3309  ;;  %v4891_v33 = vsub.f32 %v4483_v52, %v4497_v8  ;;  %v4893_v8 = vsub.f32 %v4502_v49, %v4517_v21 }
 0x2a6   : > { %3319 = vpow2.f32 %v1976_v46  ;;  %v1950_v58 = vsub.f32 %v4364_v40, %v1929_v28  ;;  %v1810_v40 = vmul.f32 1.442695, %v4883_v30  ;;  %v4895_v30 = vsub.f32 %v4522_v63, %v4537_v37 }
 0x2a7   : > { %v1826_v34 = vmul.f32 1.442695, %v4891_v33  ;;  %v1830_v52 = vmul.f32 1.442695, %v4893_v8 }
 0x2a8   : > { %v3312_v1 = vpop.eup %3311  ;;  %v1980_v22 = vmul.f32 1.442695, %v1950_v58  ;;  %v1834_v21 = vmul.f32 1.442695, %v4895_v30  ;;  %v4899_v30 = vld [vmem:[#allocation13_spill] sm:$0xff] (!%p2165_p2) }
 0x2a9   : > { %2000 = vadd.xlane.f32.xlu0 %v3312_v1  ;;  %2006 = vadd.xlane.f32.xlu1 %v3310_v59  ;;  %v3314_v29 = vpop.eup %3313  ;;  %v4892_v59 = vsub.f32 %v4471_v35, %v4481_v12  ;;  %v4894_v35 = vsub.f32 %v4490_v41, %v4500_v11  ;;  %v4897_v41 = vsub.f32 %v4542_v54, %v4555_v61 }
 0x2aa   : > { %3321 = vpow2.f32 %v1980_v22  ;;  %v1781_v22 = vld [vmem:[#allocation4 + $0x28] sm:$0xff]  ;;  %vm2169_vm6 = vcmp.eq.s32.totalorder (!%p2165_p2), %v4899_v30, %v4069_v4 }
 0x2ab   : > { %3323 = vpow2.f32 %v1810_v40  ;;  %v1824_v5 = vmul.f32 1.442695, %v4892_v59  ;;  %v1828_v12 = vmul.f32 1.442695, %v4894_v35  ;;  %v1788_v59 = vld [vmem:[#allocation4 + $0x60] sm:$0xff] }
 0x2ac   : > { %v3316_v43 = vpop.eup %3315  ;;  %3325 = vpow2.f32 %v1808_v6 }
 0x2ad   : > { %2004 = vadd.xlane.f32.xlu0 %v3316_v43  ;;  %2010 = vadd.xlane.f32.xlu1 %v3314_v29  ;;  %v3318_v39 = vpop.eup %3317  ;;  %3327 = vpow2.f32 %v1812_v24  ;;  %v4896_v24 = vsub.f32 %v4510_v50, %v4520_v51  ;;  %v4898_v51 = vsub.f32 %v4530_v14, %v4540_v62 }
 0x2ae   : > { %3329 = vpow2.f32 %v1814_v31  ;;  %v1838_v31 = vmul.f32 1.442695, %v4897_v41 }
 0x2af   : > { %3331 = vpow2.f32 %v1818_v55  ;;  %v1832_v60 = vmul.f32 1.442695, %v4896_v24  ;;  %v1836_v50 = vmul.f32 1.442695, %v4898_v51  ;;  %v4902_v24 = vld [vmem:[#allocation19_spill] sm:$0xff] (!%p2165_p2)  ;;  %v4908_v51 = vld [vmem:[#allocation18_spill] sm:$0xff] (!%p2165_p2) }
 0x2b0   : > { %v3320_v57 = vpop.eup %3319  ;;  %3333 = vpow2.f32 %v1816_v25  ;;  %vm2176_vm11 = vcmp.eq.s32.totalorder (!%p2165_p2), %v4908_v51, %v4069_v4 }
 0x2b1   : > { %2008 = vadd.xlane.f32.xlu0 %v3320_v57  ;;  %2014 = vadd.xlane.f32.xlu1 %v3318_v39  ;;  %3335 = vpow2.f32 %v1822_v0  ;;  %v1780_v57 = vld [vmem:[#allocation4 + $0x20] sm:$0xff] }
 0x2b2   : > { %3337 = vpow2.f32 %v1820_v18  ;;  %v1786_v18 = vld [vmem:[#allocation4 + $0x50] sm:$0xff] }
 0x2b3   : > { %3339 = vpow2.f32 %v1826_v34 }
 0x2b4   : > { %v3322_v15 = vpop.eup %3321  ;;  %3341 = vpow2.f32 %v1824_v5 }
 0x2b5   : > { %2012 = vadd.xlane.f32.xlu0 %v3322_v15  ;;  %v3324_v32 = vpop.eup %3323  ;;  %3343 = vpow2.f32 %v1830_v52 }
 0x2b6   : > { %v1841_v53 = vmul.f32 %v3324_v32, %v1777_v45  ;;  %v3326_v44 = vpop.eup %3325  ;;  %3345 = vpow2.f32 %v1828_v12  ;;  %v1785_v32 = vld [vmem:[#allocation4 + $0x48] sm:$0xff]  ;;  %v1782_v45 = vld [vmem:[#allocation4 + $0x30] sm:$0xff] }
 0x2b7   : > { %v3328_v7 = vpop.eup %3327  ;;  %v1840_v23 = vmul.f32 %v3326_v44, %v1776_v20  ;;  %3347 = vpow2.f32 %v1834_v21  ;;  %v1784_v20 = vld [vmem:[#allocation4 + $0x40] sm:$0xff] }
 0x2b8   : > { %v3330_v13 = vpop.eup %3329  ;;  %v1842_v38 = vmul.f32 %v3328_v7, %v1778_v2  ;;  %3349 = vpow2.f32 %v1832_v60  ;;  %v4900_v21 = vld [vmem:[#allocation14_spill] sm:$0xff] (!%p2165_p2) }
 0x2b9   : > { %v1843_v10 = vmul.f32 %v3330_v13, %v1779_v36  ;;  %v3332_v58 = vpop.eup %3331  ;;  %3351 = vpow2.f32 %v1838_v31  ;;  %vm2172_vm7 = vcmp.eq.s32.totalorder (!%p2165_p2), %v4900_v21, %v4069_v4  ;;  %v2219_v21 = vld [vmem:[#allocation5 + $0x10] sm:$0xff] (!%p2165_p2) }
 0x2ba   : > { %v3334_v43 = vpop.eup %3333  ;;  %v1845_v39 = vmul.f32 %v3332_v58, %v1781_v22  ;;  %3353 = vpow2.f32 %v1836_v50  ;;  %v1791_v58 = vld [vmem:[#allocation4 + $0x78] sm:$0xff] }
 0x2bb   : > { %v1844_v40 = vmul.f32 %v3334_v43, %v1780_v57  ;;  %v3336_v16 = vpop.eup %3335  ;;  %v1790_v43 = vld [vmem:[#allocation4 + $0x70] sm:$0xff] }
 0x2bc   : > { %v3338_v37 = vpop.eup %3337  ;;  %v1847_v63 = vmul.f32 %v3336_v16, %v1783_v3  ;;  %v4901_v3 = vld [vmem:[#allocation11_spill] sm:$0xff] (!%p2165_p2)  ;;  %v4909_v50 = vld [vmem:[#allocation20_spill] sm:$0xff] (!%p2165_p2) }
 0x2bd   : > { %v3340_v27 = vpop.eup %3339  ;;  %v1846_v61 = vmul.f32 %v3338_v37, %v1782_v45  ;;  %vm2170_vm8 = vcmp.eq.s32.totalorder (!%p2165_p2), %v4901_v3, %v4069_v4  ;;  %v4905_v37 = vld [vmem:[#allocation17_spill] sm:$0xff] (!%p2165_p2)  ;;  %vm2175_vm12 = vcmp.eq.s32.totalorder (!%p2165_p2), %v4909_v50, %v4069_v4 }
 0x2be   : > { %v3342_v25 = vpop.eup %3341  ;;  %v1849_v54 = vmul.f32 %v3340_v27, %v1785_v32  ;;  %vm2173_vm10 = vcmp.eq.s32.totalorder (!%p2165_p2), %v4905_v37, %v4069_v4  ;;  %v2221_v37 = vld [vmem:[#allocation5 + $0x20] sm:$0xff] (!%p2165_p2) }
 0x2bf   : > { %v1848_v14 = vmul.f32 %v3342_v25, %v1784_v20  ;;  %v4910_v25 = vld [vmem:[#allocation22_spill] sm:$0xff] (!%p2165_p2)  ;;  %v4913_v20 = vld [vmem:[#allocation24_spill] sm:$0xff] (!%p2165_p2) }
 0x2c0   : > { %vm2177_vm14 = vcmp.eq.s32.totalorder (!%p2165_p2), %v4913_v20, %v4069_v4 }
 0x31a   : > { %v1987_v26 = vpop.xlane.xlu0 %1986 }
 0x31b   : > { %v2017_v17 = vadd.f32 %v1987_v26, %v1841_v53  ;;  %v3344_v53 = vpop.eup %3343 }
 0x31c   : > { %v3346_v7 = vpop.eup %3345 }
 0x31d   : > { %2034 = vst.msk [vmem:[#allocation4 + $0x8] sm:$0xff] %vm2032_vm3, %v2017_v17  ;;  %v1787_v17 = vld [vmem:[#allocation4 + $0x58] sm:$0xff] }
 0x31e   : > { %v1985_v56 = vpop.xlane.xlu1 %1984  ;;  %v1851_v62 = vmul.f32 %v3344_v53, %v1787_v17  ;;  %v4912_v17 = vld [vmem:[#allocation21_spill] sm:$0xff] (!%p2165_p2) }
 0x31f   : > { %v2016_v46 = vadd.f32 %v1985_v56, %v1840_v23  ;;  %v3348_v23 = vpop.eup %3347  ;;  %vm2178_vm13 = vcmp.eq.s32.totalorder (!%p2165_p2), %v4912_v17, %v4069_v4 }
 0x320   : > { %v3350_v33 = vpop.eup %3349  ;;  %v1853_v34 = vmul.f32 %v3348_v23, %v1789_v48  ;;  %v4918_v48 = vld [vmem:[#allocation28_spill] sm:$0xff] (!%p2165_p2) }
 0x321   : > { %2033 = vst.msk [vmem:[#allocation4] sm:$0xff] %vm2032_vm3, %v2016_v46  ;;  %v1850_v46 = vmul.f32 %v3346_v7, %v1786_v18  ;;  %v1852_v22 = vmul.f32 %v3350_v33, %v1788_v59  ;;  %v4915_v7 = vld [vmem:[#allocation27_spill] sm:$0xff] (!%p2165_p2) }
 0x322   : > { %v1989_v28 = vpop.xlane.xlu0 %1988 }
 0x323   : > { %v1991_v42 = vpop.xlane.xlu1 %1990  ;;  %v2018_v1 = vadd.f32 %v1989_v28, %v1842_v38  ;;  %v3352_v38 = vpop.eup %3351 }
 0x324   : > { %v2019_v29 = vadd.f32 %v1991_v42, %v1843_v10  ;;  %v3354_v8 = vpop.eup %3353 }
 0x325   : > { %2035 = vst.msk [vmem:[#allocation4 + $0x10] sm:$0xff] %vm2032_vm3, %v2018_v1  ;;  %v1855_v1 = vmul.f32 %v3352_v38, %v1791_v58  ;;  %v1854_v35 = vmul.f32 %v3354_v8, %v1790_v43  ;;  %v4921_v38 = vld [vmem:[#allocation32_spill] sm:$0xff] (!%p2165_p2)  ;;  %v4923_v58 = vld [vmem:[#allocation34_spill] sm:$0xff] (!%p2165_p2) }
 0x326   : > { %2036 = vst.msk [vmem:[#allocation4 + $0x18] sm:$0xff] %vm2032_vm3, %v2019_v29  ;;  %vm2181_vm2 = vcmp.eq.s32.totalorder (!%p2165_p2), %v4921_v38, %v4069_v4  ;;  %v4926_v8 = vld [vmem:[#allocation36_spill] sm:$0xff] (!%p2165_p2) }
 0x327   : > { %v1995_v15 = vpop.xlane.xlu1 %1994 }
 0x328   : > { %v2021_v49 = vadd.f32 %v1995_v15, %v1845_v39 }
 0x32a   : > { %2038 = vst.msk [vmem:[#allocation4 + $0x28] sm:$0xff] %vm2032_vm3, %v2021_v49  ;;  %v1993_v6 = vpop.xlane.xlu0 %1992  ;;  %v3486_v49 = vmov (!%p2165_p2), 0.0  }
 0x32b   : > { %v2020_v11 = vadd.f32 %v1993_v6, %v1844_v40  ;;  %v2597_v40 = vsel (!%p2165_p2), %vm2171_vm5, 1.0, %v3486_v49  ;;  %v2595_v16 = vsel (!%p2165_p2), %vm2169_vm6, 1.0, %v3486_v49  ;;  %v2598_v6 = vsel (!%p2165_p2), %vm2172_vm7, 1.0, %v3486_v49 }
 0x32c   : > { %v2235_v60 = vmul.f32 (!%p2165_p2), %v4902_v24, %v2597_v40  ;;  %v2596_v31 = vsel (!%p2165_p2), %vm2170_vm8, 1.0, %v3486_v49  ;;  %v2600_v45 = vsel (!%p2165_p2), %vm2174_vm9, 1.0, %v3486_v49  ;;  %v2603_v23 = vsel (!%p2165_p2), %vm2177_vm14, 1.0, %v3486_v49  ;;  %v2217_v40 = vld [vmem:[#allocation5] sm:$0xff] (!%p2165_p2)  ;;  %v2220_v24 = vld [vmem:[#allocation5 + $0x18] sm:$0xff] (!%p2165_p2) }
 0x32d   : > { %2037 = vst.msk [vmem:[#allocation4 + $0x20] sm:$0xff] %vm2032_vm3, %v2020_v11  ;;  %v4903_v11 = vld [vmem:[#allocation12_spill] sm:$0xff] (!%p2165_p2) }
 0x32e   : > { %v1999_v55 = vpop.xlane.xlu1 %1998  ;;  %v2233_v41 = vmul.f32 (!%p2165_p2), %v4903_v11, %v2595_v16  ;;  %2253 = vadd.xlane.f32.xlu1 (!%p2165_p2), %v2235_v60  ;;  %v2218_v60 = vld [vmem:[#allocation5 + $0x8] sm:$0xff] (!%p2165_p2) }
 0x32f   : > { %v2023_v9 = vadd.f32 %v1999_v55, %v1847_v63  ;;  %v4906_v63 = vld [vmem:[#allocation16_spill] sm:$0xff] (!%p2165_p2)  ;;  %v4907_v55 = vld [vmem:[#allocation10_spill] sm:$0xff] (!%p2165_p2) }
 0x330   : > { %2249 = vadd.xlane.f32.xlu0 (!%p2165_p2), %v2233_v41  ;;  %v2236_v27 = vmul.f32 (!%p2165_p2), %v4906_v63, %v2598_v6  ;;  %v2234_v32 = vmul.f32 (!%p2165_p2), %v4907_v55, %v2596_v31 }
 0x331   : > { %2040 = vst.msk [vmem:[#allocation4 + $0x38] sm:$0xff] %vm2032_vm3, %v2023_v9  ;;  %v2599_v9 = vsel (!%p2165_p2), %vm2173_vm10, 1.0, %v3486_v49 }
 0x332   : > { %v2003_v26 = vpop.xlane.xlu1 %2002  ;;  %v1997_v44 = vpop.xlane.xlu0 %1996  ;;  %2255 = vadd.xlane.f32.xlu1 (!%p2165_p2), %v2236_v27 }
 0x333   : > { %v2025_v19 = vadd.f32 %v2003_v26, %v1849_v54  ;;  %v2022_v0 = vadd.f32 %v1997_v44, %v1846_v61  ;;  %v2238_v54 = vmul.f32 (!%p2165_p2), %v4910_v25, %v2600_v45  ;;  %v4911_v61 = vld [vmem:[#allocation23_spill] sm:$0xff] (!%p2165_p2)  ;;  %v2602_v26 = vsel (!%p2165_p2), %vm2176_vm11, 1.0, %v3486_v49  ;;  %v2224_v45 = vld [vmem:[#allocation5 + $0x38] sm:$0xff] (!%p2165_p2) }
 0x334   : > { %2251 = vadd.xlane.f32.xlu0 (!%p2165_p2), %v2234_v32  ;;  %v2237_v53 = vmul.f32 (!%p2165_p2), %v4911_v61, %v2599_v9  ;;  %v2601_v44 = vsel (!%p2165_p2), %vm2175_vm12, 1.0, %v3486_v49  ;;  %v2223_v9 = vld [vmem:[#allocation5 + $0x30] sm:$0xff] (!%p2165_p2)  ;;  %v2226_v61 = vld [vmem:[#allocation5 + $0x48] sm:$0xff] (!%p2165_p2) }
 0x335   : > { %2042 = vst.msk [vmem:[#allocation4 + $0x48] sm:$0xff] %vm2032_vm3, %v2025_v19  ;;  %2039 = vst.msk [vmem:[#allocation4 + $0x30] sm:$0xff] %vm2032_vm3, %v2022_v0  ;;  %v4914_v19 = vld [vmem:[#allocation25_spill] sm:$0xff] (!%p2165_p2) }
 0x336   : > { %v2007_v2 = vpop.xlane.xlu1 %2006  ;;  %v2001_v13 = vpop.xlane.xlu0 %2000  ;;  %2259 = vadd.xlane.f32.xlu1 (!%p2165_p2), %v2238_v54  ;;  %v2240_v0 = vmul.f32 (!%p2165_p2), %v4914_v19, %v2602_v26  ;;  %v2228_v19 = vld [vmem:[#allocation5 + $0x58] sm:$0xff] (!%p2165_p2) }
 0x337   : > { %v2027_v56 = vadd.f32 %v2007_v2, %v1851_v62  ;;  %v2024_v36 = vadd.f32 %v2001_v13, %v1848_v14  ;;  %v2239_v62 = vmul.f32 (!%p2165_p2), %v4915_v7, %v2601_v44  ;;  %v2604_v14 = vsel (!%p2165_p2), %vm2178_vm13, 1.0, %v3486_v49  ;;  %v4916_v2 = vld [vmem:[#allocation26_spill] sm:$0xff] (!%p2165_p2)  ;;  %v4917_v13 = vld [vmem:[#allocation29_spill] sm:$0xff] (!%p2165_p2) }
 0x338   : > { %2257 = vadd.xlane.f32.xlu0 (!%p2165_p2), %v2237_v53  ;;  %vm2180_vm15 = vcmp.eq.s32.totalorder (!%p2165_p2), %v4916_v2, %v4069_v4  ;;  %vm2179_vm0 = vcmp.eq.s32.totalorder (!%p2165_p2), %v4917_v13, %v4069_v4  ;;  %v2242_v18 = vmul.f32 (!%p2165_p2), %v4918_v48, %v2604_v14  ;;  %v2225_v53 = vld [vmem:[#allocation5 + $0x40] sm:$0xff] (!%p2165_p2)  ;;  %v2230_v2 = vld [vmem:[#allocation5 + $0x68] sm:$0xff] (!%p2165_p2) }
 0x339   : > { %2044 = vst.msk [vmem:[#allocation4 + $0x58] sm:$0xff] %vm2032_vm3, %v2027_v56  ;;  %2041 = vst.msk [vmem:[#allocation4 + $0x40] sm:$0xff] %vm2032_vm3, %v2024_v36  ;;  %v4919_v56 = vld [vmem:[#allocation30_spill] sm:$0xff] (!%p2165_p2)  ;;  %v2606_v33 = vsel (!%p2165_p2), %vm2180_vm15, 1.0, %v3486_v49 }
 0x33a   : > { %v2011_v10 = vpop.xlane.xlu1 %2010  ;;  %v2005_v28 = vpop.xlane.xlu0 %2004  ;;  %2263 = vadd.xlane.f32.xlu1 (!%p2165_p2), %v2240_v0  ;;  %v2241_v36 = vmul.f32 (!%p2165_p2), %v4919_v56, %v2603_v23  ;;  %v2227_v0 = vld [vmem:[#allocation5 + $0x50] sm:$0xff] (!%p2165_p2)  ;;  %v2229_v13 = vld [vmem:[#allocation5 + $0x60] sm:$0xff] (!%p2165_p2) }
 0x33b   : > { %v2029_v5 = vadd.f32 %v2011_v10, %v1853_v34  ;;  %v2026_v42 = vadd.f32 %v2005_v28, %v1850_v46  ;;  %v2605_v34 = vsel (!%p2165_p2), %vm2179_vm0, 1.0, %v3486_v49  ;;  %v4920_v46 = vld [vmem:[#allocation31_spill] sm:$0xff] (!%p2165_p2)  ;;  %v4922_v10 = vld [vmem:[#allocation33_spill] sm:$0xff] (!%p2165_p2) }
 0x33c   : > { %2261 = vadd.xlane.f32.xlu0 (!%p2165_p2), %v2239_v62  ;;  %vm2182_vm1 = vcmp.eq.s32.totalorder (!%p2165_p2), %v4920_v46, %v4069_v4  ;;  %v2244_v28 = vmul.f32 (!%p2165_p2), %v4922_v10, %v2606_v33  ;;  %v2243_v59 = vmul.f32 (!%p2165_p2), %v4923_v58, %v2605_v34  ;;  %v2232_v33 = vld [vmem:[#allocation5 + $0x78] sm:$0xff] (!%p2165_p2)  ;;  %v2231_v34 = vld [vmem:[#allocation5 + $0x70] sm:$0xff] (!%p2165_p2) }
 0x33d   : > { %2046 = vst.msk [vmem:[#allocation4 + $0x68] sm:$0xff] %vm2032_vm3, %v2029_v5  ;;  %2043 = vst.msk [vmem:[#allocation4 + $0x50] sm:$0xff] %vm2032_vm3, %v2026_v42  ;;  %v2608_v5 = vsel (!%p2165_p2), %vm2182_vm1, 1.0, %v3486_v49  ;;  %v2607_v42 = vsel (!%p2165_p2), %vm2181_vm2, 1.0, %v3486_v49 }
 0x33e   : > { %v2015_v52 = vpop.xlane.xlu1 %2014  ;;  %v2009_v29 = vpop.xlane.xlu0 %2008  ;;  %2267 = vadd.xlane.f32.xlu1 (!%p2165_p2), %v2242_v18 }
 0x33f   : > { %v2031_v39 = vadd.f32 %v2015_v52, %v1855_v1  ;;  %v2028_v57 = vadd.f32 %v2009_v29, %v1852_v22  ;;  %2168 = sbr.rel (%p2165_p2) target bundleno = 989 (0x3dd), region = 40  ;;  %v4924_v1 = vld [vmem:[#allocation35_spill] sm:$0xff] (!%p2165_p2)  ;;  %v4925_v22 = vld [vmem:[#allocation37_spill] sm:$0xff] (!%p2165_p2)  ;;  %v2246_v52 = vmul.f32 (!%p2165_p2), %v4926_v8, %v2608_v5  ;;  %v4927_v29 = vld [vmem:[#allocation38_spill] sm:$0xff] (!%p2165_p2) }
 0x340   : > { %2265 = vadd.xlane.f32.xlu0 (!%p2165_p2), %v2241_v36  ;;  %vm2184_vm4 = vcmp.eq.s32.totalorder (!%p2165_p2), %v4924_v1, %v4069_v4  ;;  %vm2183_vm5 = vcmp.eq.s32.totalorder (!%p2165_p2), %v4925_v22, %v4069_v4  ;;  %v2245_v43 = vmul.f32 (!%p2165_p2), %v4927_v29, %v2607_v42 }
 0x341   : > { %2048 = vst.msk [vmem:[#allocation4 + $0x78] sm:$0xff] %vm2032_vm3, %v2031_v39  ;;  %2045 = vst.msk [vmem:[#allocation4 + $0x60] sm:$0xff] %vm2032_vm3, %v2028_v57  ;;  %v2610_v39 = vsel (!%p2165_p2), %vm2184_vm4, 1.0, %v3486_v49  ;;  %v2609_v57 = vsel (!%p2165_p2), %vm2183_vm5, 1.0, %v3486_v49 }
 0x342   : > { %v2013_v12 = vpop.xlane.xlu0 %2012  ;;  %2271 = vadd.xlane.f32.xlu1 (!%p2165_p2), %v2244_v28 }
 0x343   : > { %v2030_v15 = vadd.f32 %v2013_v12, %v1854_v35  ;;  %v4928_v35 = vld [vmem:[#allocation39_spill] sm:$0xff] (!%p2165_p2) }
 0x344   : > { %2269 = vadd.xlane.f32.xlu0 (!%p2165_p2), %v2243_v59  ;;  %v2248_v12 = vmul.f32 (!%p2165_p2), %v4928_v35, %v2610_v39 }
 0x345   : > { %2047 = vst.msk [vmem:[#allocation4 + $0x70] sm:$0xff] %vm2032_vm3, %v2030_v15  ;;  %v4929_v15 = vld [vmem:[#allocation40_spill] sm:$0xff] (!%p2165_p2) }
 0x346   : > { %2275 = vadd.xlane.f32.xlu1 %v2246_v52  ;;  %v2247_v30 = vmul.f32 %v4929_v15, %v2609_v57 }
 0x348   : > { %2273 = vadd.xlane.f32.xlu0 %v2245_v43 }
 0x34a   : > { %2279 = vadd.xlane.f32.xlu1 %v2248_v12 }
 0x34c   : > { %2277 = vadd.xlane.f32.xlu0 %v2247_v30 }
 0x3bb   : > { %v2254_v16 = vpop.xlane.xlu1 %2253 }
 0x3bc   : > { %v2283_v6 = vadd.f32 %v2254_v16, %v2219_v21 }
 0x3bd   : > { %v2250_v4 = vpop.xlane.xlu0 %2249 }
 0x3be   : > { %v2281_v3 = vadd.f32 %v2250_v4, %v2217_v40  ;;  %2299 = vst.msk [vmem:[#allocation5 + $0x10] sm:$0xff] %vm2032_vm3, %v2283_v6 }
 0x3bf   : > { %v2256_v49 = vpop.xlane.xlu1 %2255 }
 0x3c0   : > { %2297 = vst.msk [vmem:[#allocation5] sm:$0xff] %vm2032_vm3, %v2281_v3  ;;  %v2284_v41 = vadd.f32 %v2256_v49, %v2220_v24 }
 0x3c1   : > { %v2252_v11 = vpop.xlane.xlu0 %2251 }
 0x3c2   : > { %v2282_v31 = vadd.f32 %v2252_v11, %v2218_v60  ;;  %2300 = vst.msk [vmem:[#allocation5 + $0x18] sm:$0xff] %vm2032_vm3, %v2284_v41 }
 0x3c3   : > { %v2260_v63 = vpop.xlane.xlu1 %2259 }
 0x3c4   : > { %2298 = vst.msk [vmem:[#allocation5 + $0x8] sm:$0xff] %vm2032_vm3, %v2282_v31  ;;  %v2286_v55 = vadd.f32 %v2260_v63, %v2222_v47 }
 0x3c5   : > { %v2258_v27 = vpop.xlane.xlu0 %2257 }
 0x3c6   : > { %v2285_v32 = vadd.f32 %v2258_v27, %v2221_v37  ;;  %2302 = vst.msk [vmem:[#allocation5 + $0x28] sm:$0xff] %vm2032_vm3, %v2286_v55 }
 0x3c7   : > { %v2264_v51 = vpop.xlane.xlu1 %2263 }
 0x3c8   : > { %2301 = vst.msk [vmem:[#allocation5 + $0x20] sm:$0xff] %vm2032_vm3, %v2285_v32  ;;  %v2288_v25 = vadd.f32 %v2264_v51, %v2224_v45 }
 0x3c9   : > { %v2262_v50 = vpop.xlane.xlu0 %2261 }
 0x3ca   : > { %v2287_v54 = vadd.f32 %v2262_v50, %v2223_v9  ;;  %2304 = vst.msk [vmem:[#allocation5 + $0x38] sm:$0xff] %vm2032_vm3, %v2288_v25 }
 0x3cb   : > { %v2268_v26 = vpop.xlane.xlu1 %2267 }
 0x3cc   : > { %2303 = vst.msk [vmem:[#allocation5 + $0x30] sm:$0xff] %vm2032_vm3, %v2287_v54  ;;  %v2290_v17 = vadd.f32 %v2268_v26, %v2226_v61 }
 0x3cd   : > { %v2266_v44 = vpop.xlane.xlu0 %2265 }
 0x3ce   : > { %v2289_v20 = vadd.f32 %v2266_v44, %v2225_v53  ;;  %2306 = vst.msk [vmem:[#allocation5 + $0x48] sm:$0xff] %vm2032_vm3, %v2290_v17 }
 0x3cf   : > { %v2272_v7 = vpop.xlane.xlu1 %2271 }
 0x3d0   : > { %2305 = vst.msk [vmem:[#allocation5 + $0x40] sm:$0xff] %vm2032_vm3, %v2289_v20  ;;  %v2292_v14 = vadd.f32 %v2272_v7, %v2228_v19 }
 0x3d1   : > { %v2270_v62 = vpop.xlane.xlu0 %2269 }
 0x3d2   : > { %v2291_v23 = vadd.f32 %v2270_v62, %v2227_v0  ;;  %2308 = vst.msk [vmem:[#allocation5 + $0x58] sm:$0xff] %vm2032_vm3, %v2292_v14 }
 0x3d3   : > { %v2276_v48 = vpop.xlane.xlu1 %2275 }
 0x3d4   : > { %2307 = vst.msk [vmem:[#allocation5 + $0x50] sm:$0xff] %vm2032_vm3, %v2291_v23  ;;  %v2294_v56 = vadd.f32 %v2276_v48, %v2230_v2 }
 0x3d5   : > { %v2274_v18 = vpop.xlane.xlu0 %2273 }
 0x3d6   : > { %v2293_v36 = vadd.f32 %v2274_v18, %v2229_v13  ;;  %2310 = vst.msk [vmem:[#allocation5 + $0x68] sm:$0xff] %vm2032_vm3, %v2294_v56 }
 0x3d7   : > { %v2280_v46 = vpop.xlane.xlu1 %2279 }
 0x3d8   : > { %2309 = vst.msk [vmem:[#allocation5 + $0x60] sm:$0xff] %vm2032_vm3, %v2293_v36  ;;  %v2296_v10 = vadd.f32 %v2280_v46, %v2232_v33 }
 0x3d9   : > { %v2278_v38 = vpop.xlane.xlu0 %2277 }
 0x3da   : > { %v2295_v28 = vadd.f32 %v2278_v38, %v2231_v34  ;;  %2312 = vst.msk [vmem:[#allocation5 + $0x78] sm:$0xff] %vm2032_vm3, %v2296_v10 }
 0x3dc   : > { %2311 = vst.msk [vmem:[#allocation5 + $0x70] sm:$0xff] %vm2032_vm3, %v2295_v28 }
 0x3dd PF: > { %p2611_p4 = scmp.ne.s32.totalorder %s3465_s20, 1 }
 0x3de   : > { %v2333_v58 = vld [vmem:[#allocation4] sm:$0xff] (!%p2611_p4)  ;;  %v2334_v59 = vld [vmem:[#allocation4 + $0x8] sm:$0xff] (!%p2611_p4)  ;;  %v2335_v5 = vld [vmem:[#allocation4 + $0x10] sm:$0xff] (!%p2611_p4) }
 0x3df   : > { %2316 = sbr.rel (%p2611_p4) target bundleno = 1024 (0x400), region = 44  ;;  %3355 = vlog2.f32 (!%p2611_p4), %v2333_v58  ;;  %v2336_v42 = vld [vmem:[#allocation4 + $0x18] sm:$0xff] (!%p2611_p4)  ;;  %v2337_v1 = vld [vmem:[#allocation4 + $0x20] sm:$0xff] (!%p2611_p4)  ;;  %v2338_v22 = vld [vmem:[#allocation4 + $0x28] sm:$0xff] (!%p2611_p4) }
 0x3e0   : > { %3357 = vlog2.f32 (!%p2611_p4), %v2334_v59  ;;  %v2339_v8 = vld [vmem:[#allocation4 + $0x30] sm:$0xff] (!%p2611_p4)  ;;  %v2340_v52 = vld [vmem:[#allocation4 + $0x38] sm:$0xff] (!%p2611_p4)  ;;  %v2341_v29 = vld [vmem:[#allocation4 + $0x40] sm:$0xff] (!%p2611_p4) }
 0x3e1   : > { %3359 = vlog2.f32 (!%p2611_p4), %v2335_v5  ;;  %v2397_v43 = vld [vmem:[#allocation5] sm:$0xff] (!%p2611_p4)  ;;  %v2342_v39 = vld [vmem:[#allocation4 + $0x48] sm:$0xff] (!%p2611_p4)  ;;  %v2399_v35 = vld [vmem:[#allocation5 + $0x10] sm:$0xff] (!%p2611_p4) }
 0x3e2   : > { %3361 = vlog2.f32 (!%p2611_p4), %v2336_v42  ;;  %v2398_v57 = vld [vmem:[#allocation5 + $0x8] sm:$0xff] (!%p2611_p4)  ;;  %v2343_v12 = vld [vmem:[#allocation4 + $0x50] sm:$0xff] (!%p2611_p4)  ;;  %v2317_v30 = vld [vmem:[#allocation3] sm:$0xff] (!%p2611_p4)  ;;  %v2413_v6 = vmul.f32 (!%p2611_p4), 2.0, %v2397_v43  ;;  %v2415_v47 = vmul.f32 (!%p2611_p4), 2.0, %v2399_v35 }
 0x3e3   : > { %3363 = vlog2.f32 (!%p2611_p4), %v2337_v1  ;;  %v2400_v21 = vld [vmem:[#allocation5 + $0x18] sm:$0xff] (!%p2611_p4)  ;;  %v2318_v3 = vld [vmem:[#allocation3 + $0x8] sm:$0xff] (!%p2611_p4)  ;;  %v2401_v24 = vld [vmem:[#allocation5 + $0x20] sm:$0xff] (!%p2611_p4)  ;;  %v2414_v41 = vmul.f32 (!%p2611_p4), 2.0, %v2398_v57 }
 0x3e4   : > { %3365 = vlog2.f32 (!%p2611_p4), %v2338_v22  ;;  %v2344_v40 = vld [vmem:[#allocation4 + $0x58] sm:$0xff] (!%p2611_p4)  ;;  %v2345_v60 = vld [vmem:[#allocation4 + $0x60] sm:$0xff] (!%p2611_p4)  ;;  %v2319_v31 = vld [vmem:[#allocation3 + $0x10] sm:$0xff] (!%p2611_p4)  ;;  %v2416_v45 = vmul.f32 (!%p2611_p4), 2.0, %v2400_v21  ;;  %v2417_v53 = vmul.f32 (!%p2611_p4), 2.0, %v2401_v24 }
 0x3e5   : > { %3367 = vlog2.f32 (!%p2611_p4), %v2339_v8  ;;  %v2346_v37 = vld [vmem:[#allocation4 + $0x68] sm:$0xff] (!%p2611_p4)  ;;  %v2320_v32 = vld [vmem:[#allocation3 + $0x18] sm:$0xff] (!%p2611_p4)  ;;  %v2347_v51 = vld [vmem:[#allocation4 + $0x70] sm:$0xff] (!%p2611_p4) }
 0x3e6   : > { %3369 = vlog2.f32 %v2340_v52  ;;  %v2402_v9 = vld [vmem:[#allocation5 + $0x28] sm:$0xff]  ;;  %v2321_v61 = vld [vmem:[#allocation3 + $0x20] sm:$0xff]  ;;  %v2403_v26 = vld [vmem:[#allocation5 + $0x30] sm:$0xff] }
 0x3e7   : > { %3371 = vlog2.f32 %v2341_v29  ;;  %v2348_v44 = vld [vmem:[#allocation4 + $0x78] sm:$0xff]  ;;  %v2322_v7 = vld [vmem:[#allocation3 + $0x28] sm:$0xff]  ;;  %v2418_v48 = vmul.f32 2.0, %v2402_v9  ;;  %v2323_v18 = vld [vmem:[#allocation3 + $0x30] sm:$0xff]  ;;  %v2419_v38 = vmul.f32 2.0, %v2403_v26 }
 0x3e8   : > { %3373 = vlog2.f32 %v2342_v39  ;;  %v2404_v62 = vld [vmem:[#allocation5 + $0x38] sm:$0xff]  ;;  %v2405_v56 = vld [vmem:[#allocation5 + $0x40] sm:$0xff]  ;;  %v2406_v28 = vld [vmem:[#allocation5 + $0x48] sm:$0xff] }
 0x3e9   : > { %v3356_v15 = vpop.eup %3355  ;;  %3375 = vlog2.f32 %v2343_v12  ;;  %v2324_v10 = vld [vmem:[#allocation3 + $0x38] sm:$0xff]  ;;  %v2420_v1 = vmul.f32 2.0, %v2404_v62  ;;  %v2325_v22 = vld [vmem:[#allocation3 + $0x40] sm:$0xff]  ;;  %v2407_v8 = vld [vmem:[#allocation5 + $0x50] sm:$0xff]  ;;  %v2421_v57 = vmul.f32 2.0, %v2405_v56 }
 0x3ea   : > { %v3358_v16 = vpop.eup %3357  ;;  %v2350_v4 = vmul.f32 0.6931472, %v3356_v15  ;;  %3377 = vlog2.f32 %v2344_v40  ;;  %v2326_v35 = vld [vmem:[#allocation3 + $0x48] sm:$0xff]  ;;  %v2408_v12 = vld [vmem:[#allocation5 + $0x58] sm:$0xff] }
 0x3eb   : > { %v3360_v49 = vpop.eup %3359  ;;  %v2352_v11 = vmul.f32 0.6931472, %v3358_v16  ;;  %3379 = vlog2.f32 %v2345_v60  ;;  %v2422_v16 = vmul.f32 2.0, %v2406_v28 }
 0x3ec   : > { %v3362_v63 = vpop.eup %3361  ;;  %v2381_v27 = vadd.f32 %v2350_v4, %v2317_v30  ;;  %v2354_v55 = vmul.f32 0.6931472, %v3360_v49  ;;  %3381 = vlog2.f32 %v2346_v37  ;;  %v2327_v4 = vld [vmem:[#allocation3 + $0x50] sm:$0xff] }
 0x3ed   : > { %v3364_v50 = vpop.eup %3363  ;;  %v2382_v25 = vadd.f32 %v2352_v11, %v2318_v3  ;;  %v2356_v54 = vmul.f32 0.6931472, %v3362_v63  ;;  %3383 = vlog2.f32 %v2347_v51  ;;  %v2423_v11 = vmul.f32 2.0, %v2407_v8 }
 0x3ee   : > { %v3366_v17 = vpop.eup %3365  ;;  %v2429_v20 = vsub.f32 %v2381_v27, %v2413_v6  ;;  %v2383_v19 = vadd.f32 %v2354_v55, %v2319_v31  ;;  %v2358_v0 = vmul.f32 0.6931472, %v3364_v50  ;;  %3385 = vlog2.f32 %v2348_v44  ;;  %v2409_v6 = vld [vmem:[#allocation5 + $0x60] sm:$0xff]  ;;  %v2410_v31 = vld [vmem:[#allocation5 + $0x68] sm:$0xff] }
 0x3ef   : > { %v3368_v14 = vpop.eup %3367  ;;  %v2430_v23 = vsub.f32 %v2382_v25, %v2414_v41  ;;  %v2384_v2 = vadd.f32 %v2356_v54, %v2320_v32  ;;  %v2360_v13 = vmul.f32 0.6931472, %v3366_v17  ;;  %v2328_v41 = vld [vmem:[#allocation3 + $0x58] sm:$0xff]  ;;  %v2424_v55 = vmul.f32 2.0, %v2408_v12  ;;  %v2329_v32 = vld [vmem:[#allocation3 + $0x60] sm:$0xff] }
 0x3f0   : > { %v3370_v36 = vpop.eup %3369  ;;  %2445 = vst.msk [vmem:[%s3597_s0] sm:$0xff] %vm2032_vm3, %v2429_v20  ;;  %v2431_v33 = vsub.f32 %v2383_v19, %v2415_v47  ;;  %v2385_v34 = vadd.f32 %v2358_v0, %v2321_v61  ;;  %v2362_v46 = vmul.f32 0.6931472, %v3368_v14  ;;  %v2425_v54 = vmul.f32 2.0, %v2409_v6  ;;  %v2330_v61 = vld [vmem:[#allocation3 + $0x68] sm:$0xff]  ;;  %v2331_v0 = vld [vmem:[#allocation3 + $0x70] sm:$0xff] }
 0x3f1   : > { %v3372_v58 = vpop.eup %3371  ;;  %2446 = vst.msk [vmem:[%s3597_s0 + $0x8] sm:$0xff] %vm2032_vm3, %v2430_v23  ;;  %v2432_v59 = vsub.f32 %v2384_v2, %v2416_v45  ;;  %v2386_v5 = vadd.f32 %v2360_v13, %v2322_v7  ;;  %v2364_v42 = vmul.f32 0.6931472, %v3370_v36  ;;  %v2411_v45 = vld [vmem:[#allocation5 + $0x70] sm:$0xff]  ;;  %v2426_v19 = vmul.f32 2.0, %v2410_v31  ;;  %v2332_v13 = vld [vmem:[#allocation3 + $0x78] sm:$0xff] }
 0x3f2   : > { %v3374_v52 = vpop.eup %3373  ;;  %2447 = vst.msk [vmem:[%s3597_s0 + $0x10] sm:$0xff] %vm2032_vm3, %v2431_v33  ;;  %v2433_v29 = vsub.f32 %v2385_v34, %v2417_v53  ;;  %v2387_v43 = vadd.f32 %v2362_v46, %v2323_v18  ;;  %v2366_v39 = vmul.f32 0.6931472, %v3372_v58  ;;  %v2412_v53 = vld [vmem:[#allocation5 + $0x78] sm:$0xff]  ;;  %v2427_v2 = vmul.f32 2.0, %v2411_v45 }
 0x3f3   : > { %v3376_v15 = vpop.eup %3375  ;;  %2448 = vst.msk [vmem:[%s3597_s0 + $0x18] sm:$0xff] %vm2032_vm3, %v2432_v59  ;;  %v2434_v30 = vsub.f32 %v2386_v5, %v2418_v48  ;;  %v2388_v21 = vadd.f32 %v2364_v42, %v2324_v10  ;;  %v2368_v40 = vmul.f32 0.6931472, %v3374_v52  ;;  %v2428_v36 = vmul.f32 2.0, %v2412_v53 }
 0x3f4   : > { %v3378_v3 = vpop.eup %3377  ;;  %2449 = vst.msk [vmem:[%s3597_s0 + $0x20] sm:$0xff] %vm2032_vm3, %v2433_v29  ;;  %v2435_v24 = vsub.f32 %v2387_v43, %v2419_v38  ;;  %v2389_v60 = vadd.f32 %v2366_v39, %v2325_v22  ;;  %v2370_v49 = vmul.f32 0.6931472, %v3376_v15 }
 0x3f5   : > { %v3380_v47 = vpop.eup %3379  ;;  %2450 = vst.msk [vmem:[%s3597_s0 + $0x28] sm:$0xff] %vm2032_vm3, %v2434_v30  ;;  %v2436_v37 = vsub.f32 %v2388_v21, %v2420_v1  ;;  %v2390_v63 = vadd.f32 %v2368_v40, %v2326_v35  ;;  %v2372_v27 = vmul.f32 0.6931472, %v3378_v3 }
 0x3f6   : > { %v3382_v9 = vpop.eup %3381  ;;  %2451 = vst.msk [vmem:[%s3597_s0 + $0x30] sm:$0xff] %vm2032_vm3, %v2435_v24  ;;  %v2437_v51 = vsub.f32 %v2389_v60, %v2421_v57  ;;  %v2391_v50 = vadd.f32 %v2370_v49, %v2327_v4  ;;  %v2374_v25 = vmul.f32 0.6931472, %v3380_v47 }
 0x3f7   : > { %v3384_v26 = vpop.eup %3383  ;;  %2452 = vst.msk [vmem:[%s3597_s0 + $0x38] sm:$0xff] %vm2032_vm3, %v2436_v37  ;;  %v2438_v44 = vsub.f32 %v2390_v63, %v2422_v16  ;;  %v2392_v17 = vadd.f32 %v2372_v27, %v2328_v41  ;;  %v2376_v20 = vmul.f32 0.6931472, %v3382_v9 }
 0x3f8   : > { %v3386_v7 = vpop.eup %3385  ;;  %2453 = vst.msk [vmem:[%s3597_s0 + $0x40] sm:$0xff] %vm2032_vm3, %v2437_v51  ;;  %v2439_v62 = vsub.f32 %v2391_v50, %v2423_v11  ;;  %v2393_v14 = vadd.f32 %v2374_v25, %v2329_v32  ;;  %v2378_v23 = vmul.f32 0.6931472, %v3384_v26 }
 0x3f9   : > { %2454 = vst.msk [vmem:[%s3597_s0 + $0x48] sm:$0xff] %vm2032_vm3, %v2438_v44  ;;  %v2440_v48 = vsub.f32 %v2392_v17, %v2424_v55  ;;  %v2394_v18 = vadd.f32 %v2376_v20, %v2330_v61  ;;  %v2380_v56 = vmul.f32 0.6931472, %v3386_v7 }
 0x3fa   : > { %2455 = vst.msk [vmem:[%s3597_s0 + $0x50] sm:$0xff] %vm2032_vm3, %v2439_v62  ;;  %v2441_v33 = vsub.f32 %v2393_v14, %v2425_v54  ;;  %v2395_v34 = vadd.f32 %v2378_v23, %v2331_v0 }
 0x3fb   : > { %2456 = vst.msk [vmem:[%s3597_s0 + $0x58] sm:$0xff] %vm2032_vm3, %v2440_v48  ;;  %v2442_v46 = vsub.f32 %v2394_v18, %v2426_v19  ;;  %v2396_v38 = vadd.f32 %v2380_v56, %v2332_v13 }
 0x3fc   : > { %2457 = vst.msk [vmem:[%s3597_s0 + $0x60] sm:$0xff] %vm2032_vm3, %v2441_v33  ;;  %v2443_v10 = vsub.f32 %v2395_v34, %v2427_v2 }
 0x3fd   : > { %2458 = vst.msk [vmem:[%s3597_s0 + $0x68] sm:$0xff] %vm2032_vm3, %v2442_v46  ;;  %v2444_v28 = vsub.f32 %v2396_v38, %v2428_v36 }
 0x3fe   : > { %2459 = vst.msk [vmem:[%s3597_s0 + $0x70] sm:$0xff] %vm2032_vm3, %v2443_v10 }
 0x3ff   : > { %2460 = vst.msk [vmem:[%s3597_s0 + $0x78] sm:$0xff] %vm2032_vm3, %v2444_v28 }
 0x400 PF: > { %s2612_s5 = sshll.u32 %s3469_s21, 1  ;;  %s2485_s7 = sshll.u32 %s3601_s25, 4  ;;  %s4750_s7 = int_to_ptr.vmem [resolvable:$true] %s2485_s7 }
 0x401   : > { %s2481_s6 = sadd.s32 %s3465_s20, %s2612_s5  ;;  %s2467_s0 = scalar_lea.sflag [#allocation8], %s212_s9 }
 0x402   : > { %s2613_s10 = sshll.u32 %s2481_s6, 4  ;;  %s3387_s14 = scalar_lea.vmem %s4750_s7, 16 }
 0x403   : > { %s2483_s13 = scalar_lea.hbm %s4805_s4, %s2613_s10  ;;  %p3388_p5 = scmp.ne.s32.totalorder %s4750_s7, %s3387_s14 }
 0x404   : > { %s3487_s21 = smov [#allocation7]  }
 0x405   : > { %p3389_p6 = pnand %p3388_p5, %p3567_p3  ;;  %s3391_s20 = sshll.u32 %s3487_s21, 4  ;;  %s3392_s20 = int_to_ptr.vmem [resolvable:$false] %s3391_s20 }
 0x406   : > { %s3393_s25 = scalar_lea.vmem %s3392_s20, 32  ;;  %p3394_p9 = scmp.lt.s32.totalorder %s4750_s7, %s3392_s20 }
 0x407   : > { %p3390_p7 = pneg %p3389_p6  ;;  %p3395_p10 = scmp.lt.s32.totalorder %s3393_s25, %s3387_s14 }
 0x409   : > { %p3396_p11 = por %p3395_p10, %p3394_p9 }
 0x40b   : > { %p3397_p12 = pnand %p3396_p11, %p3390_p7 }
 0x40d   : > { %3400 = shalt.err (!%p3397_p12)
}
 0x40e   : > { %s3401_s15 = scalar_lea.hbm %s2483_s13, 16  ;;  %s3405_s28 = scalar_lea.hbm %s4805_s4, 64 }
 0x40f   : > { %p3402_p13 = scmp.ne.s32.totalorder %s2483_s13, %s3401_s15  ;;  %p3406_p2 = scmp.lt.u32.totalorder %s2483_s13, %s4805_s4 }
 0x410   : > { %p3407_p4 = scmp.lt.u32.totalorder %s3405_s28, %s3401_s15  ;;  %p3409_p6 = scmp.lt.u32.totalorder %s3401_s15, %s2483_s13 }
 0x411   : > { %p3403_p0 = pnand %p3402_p13, %p3567_p3 }
 0x412   : > { %p3408_p5 = por %p3407_p4, %p3406_p2 }
 0x413   : > { %p3404_p1 = pneg %p3403_p0 }
 0x414   : > { %p3410_p9 = por %p3409_p6, %p3408_p5 }
 0x416   : > { %p3411_p7 = pnand %p3410_p9, %p3404_p1 }
 0x418   : > { %3414 = shalt.err (!%p3411_p7)
}
 0x419   : > { %3180 = dma.vmem_to_hbm [thread:$0]  (%p3567_p3), %s4750_s7, 16, %s2483_s13, %s2467_s0  }
 0x41a PF: > { %p3186_p10 = scmp.ge.s32.totalorder %s3481_s24, 2  ;;  %s2505_s10 = sand.u32 1, %s3453_s17  }
 0x41b   : > { %s2506_s11 = scalar_lea.sflag [#allocation8], %s2505_s10 }
 0x41c   : > { %p3183_p11 = pnand %p3186_p10, %p3576_p8 }
 0x41e   : > { %3448 = dma.done.wait (!%p3183_p11), %s2506_s11, 16  }
 0x41f   : > { %3450 = vsyncadd (!%p3183_p11), %s2506_s11, 4294967280  ;;  %s19_s24 = sadd.s32 1, %s3481_s24   ;;  %s4930_s17 = smov %s3457_s18 }
 0x420   : > { %p16_p12 = scmp.ge.s32.totalorder %s19_s24, 6   ;;  %s4931_s18 = smov %s3461_s19 }
 0x421   : > { %s4932_s19 = smov %s3585_s8  ;;  %s4933_s20 = smov %s3473_s22 }
 0x422   : > { %s4934_s21 = smov %s3477_s23  ;;  %s4935_s22 = smov %s4938_s26 }
 0x423   : > { %s4936_s23 = smov %s4942_s27  ;;  %18 = sbr.rel (!%p16_p12) target bundleno = 7 (0x7), region = 92 }
 0x42a   :  { %2510 = vsyncpa [#allocation8], 1 }
 0x42b   :  { %2512 = vsyncpa [#allocation8 + $0x1], 1 }

</bundles_post_ra>
